<compile_context>
chip_gen: v7x
topology: tpu7x:2x2x1
jax: 0.10.0
libtpu: 0.0.40
codegen_flags: <defaults>
</compile_context>

<pallas_src>
import functools

import jax
import jax.numpy as jnp
from jax import lax
from jax.experimental import pallas as pl
from jax.experimental.pallas import tpu as pltpu


# Conv hyper-parameters from the PyTorch module: (Cin, Cout, kh, stride, pad)
_CONVS = (
    (1, 2, 10, 6, 1),
    (2, 4, 9, 5, 1),
    (4, 8, 8, 4, 1),
)
_FC1_IN, _FC1_OUT = 32, 16
_FC2_OUT = 2
_H3 = _FC1_IN // _CONVS[-1][1]          # spatial rows feeding fc1 (= 4)


def _align8(r):
    return (r + 7) // 8 * 8


# --------------------------- parameter packing ----------------------------- #

def _pack_layout(g):
    """(row_offset, n_rows, n_cols) of every packed block; 8-row aligned."""
    dims = []
    for cin, cout, kh, _, _ in _CONVS:
        dims.append((kh * g * cin, g * cout))               # block-diag conv weight
        dims.append((1, g * cout))                          # bias
    dims.append((_H3 * g * _CONVS[-1][1], g * _FC1_OUT))    # fc1 weight
    dims.append((1, g * _FC1_OUT))                          # fc1 bias
    dims.append((g * _FC1_OUT, g * _FC2_OUT))               # fc2 weight
    dims.append((1, g * _FC2_OUT))                          # fc2 bias
    offs, row = [], 0
    for nr, nc in dims:
        offs.append((row, nr, nc))
        row += _align8(nr)                                  # 8-row aligned blocks
    return tuple(offs), _align8(row), g * _FC1_OUT          # offsets, rows, width


def pack_params(params, g):
    """Pack all SunNet weights/biases into one (rows, g*16) f32 slab.

    Weights are expanded to lane-group block-diagonal form (lanes carry
    (sample-in-group, channel)); torch's .view(-1, 32) (c-major, h-minor)
    flatten is folded into the fc1 weight so the kernel needs no in-kernel
    reshapes or transposes.
    """
    eye = jnp.eye(g, dtype=jnp.float32)

    def conv_block(w, b):
        cout, cin, kh, _ = w.shape
        wt = jnp.transpose(w[..., 0], (2, 1, 0))             # (kh, cin, cout)
        wb = (eye[None, :, None, :, None] * wt[:, None, :, None, :]).reshape(
            kh * g * cin, g * cout)                          # rows (k, b, cin)
        return [wb, jnp.tile(b, g)[None, :]]

    blocks = []
    for i in range(3):
        blocks += conv_block(params[f"w{i + 1}"], params[f"b{i + 1}"])

    c3 = _CONVS[-1][1]
    wr = jnp.transpose(params["fc1_w"].reshape(_FC1_OUT, c3, _H3), (2, 1, 0))
    wf1 = (eye[None, :, None, :, None] * wr[:, None, :, None, :]).reshape(
        _H3 * g * c3, g * _FC1_OUT)                          # rows (h, b, c)
    wt2 = params["fc2_w"].T                                  # (16, 2)
    wf2 = (eye[:, None, :, None] * wt2[None, :, None, :]).reshape(
        g * _FC1_OUT, g * _FC2_OUT)
    blocks += [wf1, jnp.tile(params["fc1_b"], g)[None, :],
               wf2, jnp.tile(params["fc2_b"], g)[None, :]]

    offs, rows, width = _pack_layout(g)
    assert len(blocks) == len(offs)
    packed = jnp.zeros((rows, width), jnp.float32)
    for blk, (r0, nr, nc) in zip(blocks, offs):
        assert blk.shape == (nr, nc), (blk.shape, nr, nc)
        packed = packed.at[r0:r0 + nr, :nc].set(blk.astype(jnp.float32))
    return packed


# ------------------------------ Pallas kernel ------------------------------ #

def _sunnet_kernel(x_ref, p_ref, o_ref, a2_ref, a3_ref, *, g, h_out, offs):
    h1, h2, h3 = h_out
    f32 = jnp.float32
    (_, co1, kh1, st1, _), (ci2, co2, kh2, st2, _), (ci3, co3, kh3, st3, _) = _CONVS

    def wrow(i, r0, nr):                 # weight row block (8-aligned offsets)
        row, _, nc = offs[i]
        return p_ref[row + r0:row + r0 + nr, 0:nc]

    def brow(i):                         # (1, nc) bias row
        row, _, nc = offs[i]
        return p_ref[row:row + 1, 0:nc]

    # ---- conv1: input pre-folded by stride 6 host-side ---------------------
    # folded[fr, p*g + b] = x_padded[b, 6*fr + p], so tap k of output row ho
    # lives at folded row ho + k // 6, lane block (k % 6) * g.  Taps 0..5 use
    # folded rows [0, h1); taps 6..9 use rows [1, h1+1) and the first 4 lane
    # blocks.  Two accumulating MXU matmuls, no strided gathers.
    acc1 = jnp.dot(x_ref[0:h1, :], wrow(0, 0, st1 * g),
                   preferred_element_type=f32)                       # taps 0..5
    acc1 = acc1 + jnp.dot(x_ref[1:h1 + 1, 0:(kh1 - st1) * g],
                          wrow(0, st1 * g, (kh1 - st1) * g),
                          preferred_element_type=f32)                # taps 6..9
    y1 = jnp.maximum(acc1 + brow(1), 0.0)                            # (h1, 2g)

    # ---- conv2: scratch rows [pad, y1, pad]; only pad rows are zeroed ------
    zero2 = jnp.zeros((1, a2_ref.shape[1]), f32)
    a2_ref[0:1, :] = zero2
    a2_ref[h1 + 1:h1 + 2, :] = zero2
    a2_ref[1:h1 + 1, :] = y1
    acc2 = jnp.dot(a2_ref[pl.ds(0, h2, stride=st2), :], wrow(2, 0, g * ci2),
                   preferred_element_type=f32)
    for k in range(1, kh2):
        acc2 = acc2 + jnp.dot(a2_ref[pl.ds(k, h2, stride=st2), :],
                              wrow(2, k * g * ci2, g * ci2),
                              preferred_element_type=f32)
    y2 = jnp.maximum(acc2 + brow(3), 0.0)                            # (h2, 4g)

    # ---- conv3 --------------------------------------------------------------
    zero3 = jnp.zeros((1, a3_ref.shape[1]), f32)
    a3_ref[0:1, :] = zero3
    a3_ref[h2 + 1:h2 + 2, :] = zero3
    a3_ref[1:h2 + 1, :] = y2
    acc3 = jnp.dot(a3_ref[pl.ds(0, h3, stride=st3), :], wrow(4, 0, g * ci3),
                   preferred_element_type=f32)
    for k in range(1, kh3):
        acc3 = acc3 + jnp.dot(a3_ref[pl.ds(k, h3, stride=st3), :],
                              wrow(4, k * g * ci3, g * ci3),
                              preferred_element_type=f32)
    y3 = jnp.maximum(acc3 + brow(5), 0.0)                            # (h3, 8g)

    # ---- fc1: .view(-1, 32) permutation is folded into the packed weight ---
    # The flatten is h3 accumulating matmuls (MXU) instead of a lane concat.
    accf = jnp.dot(y3[0:1, :], wrow(6, 0, g * co3), preferred_element_type=f32)
    for hh in range(1, h3):
        accf = accf + jnp.dot(y3[hh:hh + 1, :], wrow(6, hh * g * co3, g * co3),
                              preferred_element_type=f32)
    f1 = jnp.maximum(accf + brow(7), 0.0)                            # (1, 16g)

    # ---- fc2 + single lane-contiguous output store --------------------------
    o_ref[...] = jnp.dot(f1, wrow(8, 0, g * _FC1_OUT),
                         preferred_element_type=f32) + brow(9)       # (1, 2g)


# ------------------------------ JAX wrapper -------------------------------- #

def _fold_conv1_input(x, g, st1, hf):
    """(n,1,H,1) -> (n//g, hf, st1*g): pad H by conv1's padding, fold the
    stride-6 phase into lanes so conv1 taps are unit-stride sublane slices."""
    n, _, h, _ = x.shape
    x2 = x.reshape(n, h).astype(jnp.float32)
    x2 = jnp.pad(x2, ((0, 0), (1, 1 + (hf * st1 - (h + 2)))))
    return x2.reshape(n // g, g, hf, st1).transpose(0, 2, 3, 1).reshape(
        n // g, hf, st1 * g)


@functools.partial(jax.jit, static_argnames=("g",))
def sunnet_forward(x, packed, g):
    n, cin, h, w = x.shape
    assert cin == 1 and w == 1 and n % g == 0
    num_groups = n // g

    h_out, cur = [], h
    for _, _, kh, stride, pad in _CONVS:
        cur = (cur + 2 * pad - kh) // stride + 1
        h_out.append(cur)
    assert h_out[-1] == _H3, (
        "conv stack must end at C*H == 32 for .view(-1, 32) to keep batch")
    h1, h2, h3 = h_out

    st1 = _CONVS[0][3]
    hf = -(-(h + 2) // st1)                       # folded rows of the conv1 input
    assert hf >= h1 + 1

    xf = _fold_conv1_input(x, g, st1, hf)

    offs, rows, width = _pack_layout(g)
    assert packed.shape == (rows, width), (packed.shape, rows, width)

    kernel = functools.partial(
        _sunnet_kernel, g=g, h_out=(h1, h2, h3), offs=offs)

    out = pl.pallas_call(
        kernel,
        out_shape=jax.ShapeDtypeStruct((num_groups, 1, g * _FC2_OUT), jnp.float32),
        grid=(num_groups,),
        in_specs=[
            pl.BlockSpec((None, hf, st1 * g), lambda i: (i, 0, 0)),   # folded input
            pl.BlockSpec((rows, width), lambda i: (0, 0)),            # params (resident)
        ],
        out_specs=pl.BlockSpec((None, 1, g * _FC2_OUT), lambda i: (i, 0, 0)),
        scratch_shapes=[
            pltpu.VMEM((h1 + 2, g * _CONVS[1][0]), jnp.float32),      # conv1 out + pads
            pltpu.VMEM((h2 + 2, g * _CONVS[2][0]), jnp.float32),      # conv2 out + pads
        ],
        compiler_params=pltpu.CompilerParams(
            dimension_semantics=("parallel",)),
    )(xf, packed)

    return out.reshape(n, _FC2_OUT)               # free XLA reshape of (G,1,2g)


# --------------------------- parameters & reference ------------------------ #

def init_params(key):
    def u(k, shape, fan_in):
        bound = 1.0 / jnp.sqrt(jnp.float32(fan_in))
        return jax.random.uniform(k, shape, jnp.float32, -bound, bound)

    ks = jax.random.split(key, 10)
    return {
        "w1": u(ks[0], (2, 1, 10, 1), 10), "b1": u(ks[1], (2,), 10),
        "w2": u(ks[2], (4, 2, 9, 1), 18),  "b2": u(ks[3], (4,), 18),
        "w3": u(ks[4], (8, 4, 8, 1), 32),  "b3": u(ks[5], (8,), 32),
        "fc1_w": u(ks[6], (16, 32), 32),   "fc1_b": u(ks[7], (16,), 32),
        "fc2_w": u(ks[8], (2, 16), 16),    "fc2_b": u(ks[9], (2,), 16),
    }


def sunnet_reference(x, p):
    def conv(h, w, b, stride, pad):
        y = lax.conv_general_dilated(
            h, w, window_strides=(stride, 1), padding=((pad, pad), (0, 0)),
            dimension_numbers=("NCHW", "OIHW", "NCHW"))
        return jax.nn.relu(y + b.reshape(1, -1, 1, 1))

    h = conv(x, p["w1"], p["b1"], 6, 1)
    h = conv(h, p["w2"], p["b2"], 5, 1)
    h = conv(h, p["w3"], p["b3"], 4, 1)
    flat = h.reshape(-1, 32)
    f1 = jax.nn.relu(flat @ p["fc1_w"].T + p["fc1_b"])
    return f1 @ p["fc2_w"].T + p["fc2_b"]


# ----------------------------------- main ----------------------------------- #

if __name__ == "__main__":
    key = jax.random.PRNGKey(0)
    pkey, xkey = jax.random.split(key)
    params = init_params(pkey)

    # H=554 makes the conv stack end at (C=8, H=4, W=1) so .view(-1, 32) keeps
    # the batch dimension, as the original model assumes.  16 samples are run
    # as 2 lane-groups of 8 on a "parallel" grid axis (g=8 makes fc1 lane-full).
    batch, group = 16, 8
    x = jax.random.normal(xkey, (batch, 1, 554, 1), jnp.float32)

    packed = pack_params(params, g=group)          # one-time host-side packing
    out = jax.block_until_ready(sunnet_forward(x, packed, g=group))

    ref = sunnet_reference(x, params)
    assert out.shape == (batch, _FC2_OUT), out.shape
    assert jnp.allclose(out, ref, atol=1e-3, rtol=1e-3), "mismatch vs reference"

    print("KERNEL_OK")
</pallas_src>

<mosaic_0001>
module attributes {stable_mosaic.version = 11 : i64} {
  func.func @_sunnet_kernel(%arg0: i32, %arg1: memref<1x93x48xf32, #tpu.memory_space<vmem>>, %arg2: memref<904x128xf32, #tpu.memory_space<vmem>>, %arg3: memref<1x1x16xf32, #tpu.memory_space<vmem>>, %arg4: memref<94x16xf32, #tpu.memory_space<vmem>>, %arg5: memref<20x32xf32, #tpu.memory_space<vmem>>) attributes {dimension_semantics = [#tpu.dimension_semantics<parallel>], iteration_bounds = array<i64: 2>, scalar_prefetch = 0 : i64, scratch_operands = 2 : i64, tpu.core_type = #tpu.core_type<tc>, window_params = [{transform_indices = @transform_0, window_bounds = array<i64: 1, 93, 48>}, {pipeline_mode = #tpu.pipeline_mode<synchronous>, transform_indices = @transform_1, window_bounds = array<i64: 904, 128>}, {transform_indices = @transform_2, window_bounds = array<i64: 1, 1, 16>}]} {
    %c0 = arith.constant 0 : index
    %c0_0 = arith.constant 0 : index
    %c0_1 = arith.constant 0 : index
    %0 = vector.load %arg1[%c0, %c0_0, %c0_1] : memref<1x93x48xf32, #tpu.memory_space<vmem>>, vector<1x92x48xf32>
    %1 = vector.shape_cast %0 : vector<1x92x48xf32> to vector<92x48xf32>
    %c0_2 = arith.constant 0 : index
    %c0_3 = arith.constant 0 : index
    %2 = vector.load %arg2[%c0_2, %c0_3] : memref<904x128xf32, #tpu.memory_space<vmem>>, vector<48x16xf32>
    %cst = arith.constant dense<0.000000e+00> : vector<92x16xf32>
    %3 = tpu.matmul %1, %2, %cst {dimension_numbers = #tpu.dot_dimension_numbers<[1], [0], [0], [1], [0, 0, 1, 1], [], []>} : vector<92x48xf32>, vector<48x16xf32>, vector<92x16xf32> -> vector<92x16xf32>
    %c0_4 = arith.constant 0 : index
    %c1 = arith.constant 1 : index
    %c0_5 = arith.constant 0 : index
    %4 = vector.load %arg1[%c0_4, %c1, %c0_5] : memref<1x93x48xf32, #tpu.memory_space<vmem>>, vector<1x92x32xf32>
    %5 = vector.shape_cast %4 : vector<1x92x32xf32> to vector<92x32xf32>
    %c48 = arith.constant 48 : index
    %c0_6 = arith.constant 0 : index
    %6 = vector.load %arg2[%c48, %c0_6] : memref<904x128xf32, #tpu.memory_space<vmem>>, vector<32x16xf32>
    %cst_7 = arith.constant dense<0.000000e+00> : vector<92x16xf32>
    %7 = tpu.matmul %5, %6, %cst_7 {dimension_numbers = #tpu.dot_dimension_numbers<[1], [0], [0], [1], [0, 0, 1, 1], [], []>} : vector<92x32xf32>, vector<32x16xf32>, vector<92x16xf32> -> vector<92x16xf32>
    %8 = arith.addf %3, %7 : vector<92x16xf32>
    %c80 = arith.constant 80 : index
    %c0_8 = arith.constant 0 : index
    %9 = vector.load %arg2[%c80, %c0_8] : memref<904x128xf32, #tpu.memory_space<vmem>>, vector<1x16xf32>
    %10 = vector.broadcast %9 : vector<1x16xf32> to vector<92x16xf32>
    %11 = arith.addf %8, %10 : vector<92x16xf32>
    %cst_9 = arith.constant 0.000000e+00 : f32
    %12 = vector.broadcast %cst_9 : f32 to vector<92x16xf32>
    %13 = arith.maximumf %11, %12 : vector<92x16xf32>
    %cst_10 = arith.constant 0.000000e+00 : f32
    %14 = vector.broadcast %cst_10 : f32 to vector<1x16xf32>
    %c0_11 = arith.constant 0 : index
    %c0_12 = arith.constant 0 : index
    %15 = vector.load %arg4[%c0_11, %c0_12] : memref<94x16xf32, #tpu.memory_space<vmem>>, vector<1x16xf32>
    tpu.vector_store %arg4[%c0_11, %c0_12], %14 {strides = array<i32>} : memref<94x16xf32, #tpu.memory_space<vmem>>, vector<1x16xf32>,
    %c93 = arith.constant 93 : index
    %c0_13 = arith.constant 0 : index
    %16 = vector.load %arg4[%c93, %c0_13] : memref<94x16xf32, #tpu.memory_space<vmem>>, vector<1x16xf32>
    tpu.vector_store %arg4[%c93, %c0_13], %14 {strides = array<i32>} : memref<94x16xf32, #tpu.memory_space<vmem>>, vector<1x16xf32>,
    %c1_14 = arith.constant 1 : index
    %c0_15 = arith.constant 0 : index
    %17 = vector.load %arg4[%c1_14, %c0_15] : memref<94x16xf32, #tpu.memory_space<vmem>>, vector<92x16xf32>
    tpu.vector_store %arg4[%c1_14, %c0_15], %13 {strides = array<i32>} : memref<94x16xf32, #tpu.memory_space<vmem>>, vector<92x16xf32>,
    %c0_16 = arith.constant 0 : index
    %c0_17 = arith.constant 0 : index
    %18 = tpu.strided_load %arg4[%c0_16, %c0_17] {strides = array<i32: 5, 1>} : memref<94x16xf32, #tpu.memory_space<vmem>>, vector<18x16xf32>
    %c88 = arith.constant 88 : index
    %c0_18 = arith.constant 0 : index
    %19 = vector.load %arg2[%c88, %c0_18] : memref<904x128xf32, #tpu.memory_space<vmem>>, vector<16x32xf32>
    %cst_19 = arith.constant dense<0.000000e+00> : vector<18x32xf32>
    %20 = tpu.matmul %18, %19, %cst_19 {dimension_numbers = #tpu.dot_dimension_numbers<[1], [0], [0], [1], [0, 0, 1, 1], [], []>} : vector<18x16xf32>, vector<16x32xf32>, vector<18x32xf32> -> vector<18x32xf32>
    %c1_20 = arith.constant 1 : index
    %c0_21 = arith.constant 0 : index
    %21 = tpu.strided_load %arg4[%c1_20, %c0_21] {strides = array<i32: 5, 1>} : memref<94x16xf32, #tpu.memory_space<vmem>>, vector<18x16xf32>
    %c104 = arith.constant 104 : index
    %c0_22 = arith.constant 0 : index
    %22 = vector.load %arg2[%c104, %c0_22] : memref<904x128xf32, #tpu.memory_space<vmem>>, vector<16x32xf32>
    %cst_23 = arith.constant dense<0.000000e+00> : vector<18x32xf32>
    %23 = tpu.matmul %21, %22, %cst_23 {dimension_numbers = #tpu.dot_dimension_numbers<[1], [0], [0], [1], [0, 0, 1, 1], [], []>} : vector<18x16xf32>, vector<16x32xf32>, vector<18x32xf32> -> vector<18x32xf32>
    %24 = arith.addf %20, %23 : vector<18x32xf32>
    %c2 = arith.constant 2 : index
    %c0_24 = arith.constant 0 : index
    %25 = tpu.strided_load %arg4[%c2, %c0_24] {strides = array<i32: 5, 1>} : memref<94x16xf32, #tpu.memory_space<vmem>>, vector<18x16xf32>
    %c120 = arith.constant 120 : index
    %c0_25 = arith.constant 0 : index
    %26 = vector.load %arg2[%c120, %c0_25] : memref<904x128xf32, #tpu.memory_space<vmem>>, vector<16x32xf32>
    %cst_26 = arith.constant dense<0.000000e+00> : vector<18x32xf32>
    %27 = tpu.matmul %25, %26, %cst_26 {dimension_numbers = #tpu.dot_dimension_numbers<[1], [0], [0], [1], [0, 0, 1, 1], [], []>} : vector<18x16xf32>, vector<16x32xf32>, vector<18x32xf32> -> vector<18x32xf32>
    %28 = arith.addf %24, %27 : vector<18x32xf32>
    %c3 = arith.constant 3 : index
    %c0_27 = arith.constant 0 : index
    %29 = tpu.strided_load %arg4[%c3, %c0_27] {strides = array<i32: 5, 1>} : memref<94x16xf32, #tpu.memory_space<vmem>>, vector<18x16xf32>
    %c136 = arith.constant 136 : index
    %c0_28 = arith.constant 0 : index
    %30 = vector.load %arg2[%c136, %c0_28] : memref<904x128xf32, #tpu.memory_space<vmem>>, vector<16x32xf32>
    %cst_29 = arith.constant dense<0.000000e+00> : vector<18x32xf32>
    %31 = tpu.matmul %29, %30, %cst_29 {dimension_numbers = #tpu.dot_dimension_numbers<[1], [0], [0], [1], [0, 0, 1, 1], [], []>} : vector<18x16xf32>, vector<16x32xf32>, vector<18x32xf32> -> vector<18x32xf32>
    %32 = arith.addf %28, %31 : vector<18x32xf32>
    %c4 = arith.constant 4 : index
    %c0_30 = arith.constant 0 : index
    %33 = tpu.strided_load %arg4[%c4, %c0_30] {strides = array<i32: 5, 1>} : memref<94x16xf32, #tpu.memory_space<vmem>>, vector<18x16xf32>
    %c152 = arith.constant 152 : index
    %c0_31 = arith.constant 0 : index
    %34 = vector.load %arg2[%c152, %c0_31] : memref<904x128xf32, #tpu.memory_space<vmem>>, vector<16x32xf32>
    %cst_32 = arith.constant dense<0.000000e+00> : vector<18x32xf32>
    %35 = tpu.matmul %33, %34, %cst_32 {dimension_numbers = #tpu.dot_dimension_numbers<[1], [0], [0], [1], [0, 0, 1, 1], [], []>} : vector<18x16xf32>, vector<16x32xf32>, vector<18x32xf32> -> vector<18x32xf32>
    %36 = arith.addf %32, %35 : vector<18x32xf32>
    %c5 = arith.constant 5 : index
    %c0_33 = arith.constant 0 : index
    %37 = tpu.strided_load %arg4[%c5, %c0_33] {strides = array<i32: 5, 1>} : memref<94x16xf32, #tpu.memory_space<vmem>>, vector<18x16xf32>
    %c168 = arith.constant 168 : index
    %c0_34 = arith.constant 0 : index
    %38 = vector.load %arg2[%c168, %c0_34] : memref<904x128xf32, #tpu.memory_space<vmem>>, vector<16x32xf32>
    %cst_35 = arith.constant dense<0.000000e+00> : vector<18x32xf32>
    %39 = tpu.matmul %37, %38, %cst_35 {dimension_numbers = #tpu.dot_dimension_numbers<[1], [0], [0], [1], [0, 0, 1, 1], [], []>} : vector<18x16xf32>, vector<16x32xf32>, vector<18x32xf32> -> vector<18x32xf32>
    %40 = arith.addf %36, %39 : vector<18x32xf32>
    %c6 = arith.constant 6 : index
    %c0_36 = arith.constant 0 : index
    %41 = tpu.strided_load %arg4[%c6, %c0_36] {strides = array<i32: 5, 1>} : memref<94x16xf32, #tpu.memory_space<vmem>>, vector<18x16xf32>
    %c184 = arith.constant 184 : index
    %c0_37 = arith.constant 0 : index
    %42 = vector.load %arg2[%c184, %c0_37] : memref<904x128xf32, #tpu.memory_space<vmem>>, vector<16x32xf32>
    %cst_38 = arith.constant dense<0.000000e+00> : vector<18x32xf32>
    %43 = tpu.matmul %41, %42, %cst_38 {dimension_numbers = #tpu.dot_dimension_numbers<[1], [0], [0], [1], [0, 0, 1, 1], [], []>} : vector<18x16xf32>, vector<16x32xf32>, vector<18x32xf32> -> vector<18x32xf32>
    %44 = arith.addf %40, %43 : vector<18x32xf32>
    %c7 = arith.constant 7 : index
    %c0_39 = arith.constant 0 : index
    %45 = tpu.strided_load %arg4[%c7, %c0_39] {strides = array<i32: 5, 1>} : memref<94x16xf32, #tpu.memory_space<vmem>>, vector<18x16xf32>
    %c200 = arith.constant 200 : index
    %c0_40 = arith.constant 0 : index
    %46 = vector.load %arg2[%c200, %c0_40] : memref<904x128xf32, #tpu.memory_space<vmem>>, vector<16x32xf32>
    %cst_41 = arith.constant dense<0.000000e+00> : vector<18x32xf32>
    %47 = tpu.matmul %45, %46, %cst_41 {dimension_numbers = #tpu.dot_dimension_numbers<[1], [0], [0], [1], [0, 0, 1, 1], [], []>} : vector<18x16xf32>, vector<16x32xf32>, vector<18x32xf32> -> vector<18x32xf32>
    %48 = arith.addf %44, %47 : vector<18x32xf32>
    %c8 = arith.constant 8 : index
    %c0_42 = arith.constant 0 : index
    %49 = tpu.strided_load %arg4[%c8, %c0_42] {strides = array<i32: 5, 1>} : memref<94x16xf32, #tpu.memory_space<vmem>>, vector<18x16xf32>
    %c216 = arith.constant 216 : index
    %c0_43 = arith.constant 0 : index
    %50 = vector.load %arg2[%c216, %c0_43] : memref<904x128xf32, #tpu.memory_space<vmem>>, vector<16x32xf32>
    %cst_44 = arith.constant dense<0.000000e+00> : vector<18x32xf32>
    %51 = tpu.matmul %49, %50, %cst_44 {dimension_numbers = #tpu.dot_dimension_numbers<[1], [0], [0], [1], [0, 0, 1, 1], [], []>} : vector<18x16xf32>, vector<16x32xf32>, vector<18x32xf32> -> vector<18x32xf32>
    %52 = arith.addf %48, %51 : vector<18x32xf32>
    %c232 = arith.constant 232 : index
    %c0_45 = arith.constant 0 : index
    %53 = vector.load %arg2[%c232, %c0_45] : memref<904x128xf32, #tpu.memory_space<vmem>>, vector<1x32xf32>
    %54 = vector.broadcast %53 : vector<1x32xf32> to vector<18x32xf32>
    %55 = arith.addf %52, %54 : vector<18x32xf32>
    %cst_46 = arith.constant 0.000000e+00 : f32
    %56 = vector.broadcast %cst_46 : f32 to vector<18x32xf32>
    %57 = arith.maximumf %55, %56 : vector<18x32xf32>
    %cst_47 = arith.constant 0.000000e+00 : f32
    %58 = vector.broadcast %cst_47 : f32 to vector<1x32xf32>
    %c0_48 = arith.constant 0 : index
    %c0_49 = arith.constant 0 : index
    %59 = vector.load %arg5[%c0_48, %c0_49] : memref<20x32xf32, #tpu.memory_space<vmem>>, vector<1x32xf32>
    tpu.vector_store %arg5[%c0_48, %c0_49], %58 {strides = array<i32>} : memref<20x32xf32, #tpu.memory_space<vmem>>, vector<1x32xf32>,
    %c19 = arith.constant 19 : index
    %c0_50 = arith.constant 0 : index
    %60 = vector.load %arg5[%c19, %c0_50] : memref<20x32xf32, #tpu.memory_space<vmem>>, vector<1x32xf32>
    tpu.vector_store %arg5[%c19, %c0_50], %58 {strides = array<i32>} : memref<20x32xf32, #tpu.memory_space<vmem>>, vector<1x32xf32>,
    %c1_51 = arith.constant 1 : index
    %c0_52 = arith.constant 0 : index
    %61 = vector.load %arg5[%c1_51, %c0_52] : memref<20x32xf32, #tpu.memory_space<vmem>>, vector<18x32xf32>
    tpu.vector_store %arg5[%c1_51, %c0_52], %57 {strides = array<i32>} : memref<20x32xf32, #tpu.memory_space<vmem>>, vector<18x32xf32>,
    %c0_53 = arith.constant 0 : index
    %c0_54 = arith.constant 0 : index
    %62 = tpu.strided_load %arg5[%c0_53, %c0_54] {strides = array<i32: 4, 1>} : memref<20x32xf32, #tpu.memory_space<vmem>>, vector<4x32xf32>
    %c240 = arith.constant 240 : index
    %c0_55 = arith.constant 0 : index
    %63 = vector.load %arg2[%c240, %c0_55] : memref<904x128xf32, #tpu.memory_space<vmem>>, vector<32x64xf32>
    %cst_56 = arith.constant dense<0.000000e+00> : vector<4x64xf32>
    %64 = tpu.matmul %62, %63, %cst_56 {dimension_numbers = #tpu.dot_dimension_numbers<[1], [0], [0], [1], [0, 0, 1, 1], [], []>} : vector<4x32xf32>, vector<32x64xf32>, vector<4x64xf32> -> vector<4x64xf32>
    %c1_57 = arith.constant 1 : index
    %c0_58 = arith.constant 0 : index
    %65 = tpu.strided_load %arg5[%c1_57, %c0_58] {strides = array<i32: 4, 1>} : memref<20x32xf32, #tpu.memory_space<vmem>>, vector<4x32xf32>
    %c272 = arith.constant 272 : index
    %c0_59 = arith.constant 0 : index
    %66 = vector.load %arg2[%c272, %c0_59] : memref<904x128xf32, #tpu.memory_space<vmem>>, vector<32x64xf32>
    %cst_60 = arith.constant dense<0.000000e+00> : vector<4x64xf32>
    %67 = tpu.matmul %65, %66, %cst_60 {dimension_numbers = #tpu.dot_dimension_numbers<[1], [0], [0], [1], [0, 0, 1, 1], [], []>} : vector<4x32xf32>, vector<32x64xf32>, vector<4x64xf32> -> vector<4x64xf32>
    %68 = arith.addf %64, %67 : vector<4x64xf32>
    %c2_61 = arith.constant 2 : index
    %c0_62 = arith.constant 0 : index
    %69 = tpu.strided_load %arg5[%c2_61, %c0_62] {strides = array<i32: 4, 1>} : memref<20x32xf32, #tpu.memory_space<vmem>>, vector<4x32xf32>
    %c304 = arith.constant 304 : index
    %c0_63 = arith.constant 0 : index
    %70 = vector.load %arg2[%c304, %c0_63] : memref<904x128xf32, #tpu.memory_space<vmem>>, vector<32x64xf32>
    %cst_64 = arith.constant dense<0.000000e+00> : vector<4x64xf32>
    %71 = tpu.matmul %69, %70, %cst_64 {dimension_numbers = #tpu.dot_dimension_numbers<[1], [0], [0], [1], [0, 0, 1, 1], [], []>} : vector<4x32xf32>, vector<32x64xf32>, vector<4x64xf32> -> vector<4x64xf32>
    %72 = arith.addf %68, %71 : vector<4x64xf32>
    %c3_65 = arith.constant 3 : index
    %c0_66 = arith.constant 0 : index
    %73 = tpu.strided_load %arg5[%c3_65, %c0_66] {strides = array<i32: 4, 1>} : memref<20x32xf32, #tpu.memory_space<vmem>>, vector<4x32xf32>
    %c336 = arith.constant 336 : index
    %c0_67 = arith.constant 0 : index
    %74 = vector.load %arg2[%c336, %c0_67] : memref<904x128xf32, #tpu.memory_space<vmem>>, vector<32x64xf32>
    %cst_68 = arith.constant dense<0.000000e+00> : vector<4x64xf32>
    %75 = tpu.matmul %73, %74, %cst_68 {dimension_numbers = #tpu.dot_dimension_numbers<[1], [0], [0], [1], [0, 0, 1, 1], [], []>} : vector<4x32xf32>, vector<32x64xf32>, vector<4x64xf32> -> vector<4x64xf32>
    %76 = arith.addf %72, %75 : vector<4x64xf32>
    %c4_69 = arith.constant 4 : index
    %c0_70 = arith.constant 0 : index
    %77 = tpu.strided_load %arg5[%c4_69, %c0_70] {strides = array<i32: 4, 1>} : memref<20x32xf32, #tpu.memory_space<vmem>>, vector<4x32xf32>
    %c368 = arith.constant 368 : index
    %c0_71 = arith.constant 0 : index
    %78 = vector.load %arg2[%c368, %c0_71] : memref<904x128xf32, #tpu.memory_space<vmem>>, vector<32x64xf32>
    %cst_72 = arith.constant dense<0.000000e+00> : vector<4x64xf32>
    %79 = tpu.matmul %77, %78, %cst_72 {dimension_numbers = #tpu.dot_dimension_numbers<[1], [0], [0], [1], [0, 0, 1, 1], [], []>} : vector<4x32xf32>, vector<32x64xf32>, vector<4x64xf32> -> vector<4x64xf32>
    %80 = arith.addf %76, %79 : vector<4x64xf32>
    %c5_73 = arith.constant 5 : index
    %c0_74 = arith.constant 0 : index
    %81 = tpu.strided_load %arg5[%c5_73, %c0_74] {strides = array<i32: 4, 1>} : memref<20x32xf32, #tpu.memory_space<vmem>>, vector<4x32xf32>
    %c400 = arith.constant 400 : index
    %c0_75 = arith.constant 0 : index
    %82 = vector.load %arg2[%c400, %c0_75] : memref<904x128xf32, #tpu.memory_space<vmem>>, vector<32x64xf32>
    %cst_76 = arith.constant dense<0.000000e+00> : vector<4x64xf32>
    %83 = tpu.matmul %81, %82, %cst_76 {dimension_numbers = #tpu.dot_dimension_numbers<[1], [0], [0], [1], [0, 0, 1, 1], [], []>} : vector<4x32xf32>, vector<32x64xf32>, vector<4x64xf32> -> vector<4x64xf32>
    %84 = arith.addf %80, %83 : vector<4x64xf32>
    %c6_77 = arith.constant 6 : index
    %c0_78 = arith.constant 0 : index
    %85 = tpu.strided_load %arg5[%c6_77, %c0_78] {strides = array<i32: 4, 1>} : memref<20x32xf32, #tpu.memory_space<vmem>>, vector<4x32xf32>
    %c432 = arith.constant 432 : index
    %c0_79 = arith.constant 0 : index
    %86 = vector.load %arg2[%c432, %c0_79] : memref<904x128xf32, #tpu.memory_space<vmem>>, vector<32x64xf32>
    %cst_80 = arith.constant dense<0.000000e+00> : vector<4x64xf32>
    %87 = tpu.matmul %85, %86, %cst_80 {dimension_numbers = #tpu.dot_dimension_numbers<[1], [0], [0], [1], [0, 0, 1, 1], [], []>} : vector<4x32xf32>, vector<32x64xf32>, vector<4x64xf32> -> vector<4x64xf32>
    %88 = arith.addf %84, %87 : vector<4x64xf32>
    %c7_81 = arith.constant 7 : index
    %c0_82 = arith.constant 0 : index
    %89 = tpu.strided_load %arg5[%c7_81, %c0_82] {strides = array<i32: 4, 1>} : memref<20x32xf32, #tpu.memory_space<vmem>>, vector<4x32xf32>
    %c464 = arith.constant 464 : index
    %c0_83 = arith.constant 0 : index
    %90 = vector.load %arg2[%c464, %c0_83] : memref<904x128xf32, #tpu.memory_space<vmem>>, vector<32x64xf32>
    %cst_84 = arith.constant dense<0.000000e+00> : vector<4x64xf32>
    %91 = tpu.matmul %89, %90, %cst_84 {dimension_numbers = #tpu.dot_dimension_numbers<[1], [0], [0], [1], [0, 0, 1, 1], [], []>} : vector<4x32xf32>, vector<32x64xf32>, vector<4x64xf32> -> vector<4x64xf32>
    %92 = arith.addf %88, %91 : vector<4x64xf32>
    %c496 = arith.constant 496 : index
    %c0_85 = arith.constant 0 : index
    %93 = vector.load %arg2[%c496, %c0_85] : memref<904x128xf32, #tpu.memory_space<vmem>>, vector<1x64xf32>
    %94 = vector.broadcast %93 : vector<1x64xf32> to vector<4x64xf32>
    %95 = arith.addf %92, %94 : vector<4x64xf32>
    %cst_86 = arith.constant 0.000000e+00 : f32
    %96 = vector.broadcast %cst_86 : f32 to vector<4x64xf32>
    %97 = arith.maximumf %95, %96 : vector<4x64xf32>
    %98 = vector.extract_strided_slice %97 {offsets = [0, 0], sizes = [1, 64], strides = [1, 1]} : vector<4x64xf32> to vector<1x64xf32>
    %c504 = arith.constant 504 : index
    %c0_87 = arith.constant 0 : index
    %99 = vector.load %arg2[%c504, %c0_87] : memref<904x128xf32, #tpu.memory_space<vmem>>, vector<64x128xf32>
    %cst_88 = arith.constant dense<0.000000e+00> : vector<1x128xf32>
    %100 = tpu.matmul %98, %99, %cst_88 {dimension_numbers = #tpu.dot_dimension_numbers<[1], [0], [0], [1], [0, 0, 1, 1], [], []>} : vector<1x64xf32>, vector<64x128xf32>, vector<1x128xf32> -> vector<1x128xf32>
    %101 = vector.extract_strided_slice %97 {offsets = [1, 0], sizes = [1, 64], strides = [1, 1]} : vector<4x64xf32> to vector<1x64xf32>
    %c568 = arith.constant 568 : index
    %c0_89 = arith.constant 0 : index
    %102 = vector.load %arg2[%c568, %c0_89] : memref<904x128xf32, #tpu.memory_space<vmem>>, vector<64x128xf32>
    %cst_90 = arith.constant dense<0.000000e+00> : vector<1x128xf32>
    %103 = tpu.matmul %101, %102, %cst_90 {dimension_numbers = #tpu.dot_dimension_numbers<[1], [0], [0], [1], [0, 0, 1, 1], [], []>} : vector<1x64xf32>, vector<64x128xf32>, vector<1x128xf32> -> vector<1x128xf32>
    %104 = arith.addf %100, %103 : vector<1x128xf32>
    %105 = vector.extract_strided_slice %97 {offsets = [2, 0], sizes = [1, 64], strides = [1, 1]} : vector<4x64xf32> to vector<1x64xf32>
    %c632 = arith.constant 632 : index
    %c0_91 = arith.constant 0 : index
    %106 = vector.load %arg2[%c632, %c0_91] : memref<904x128xf32, #tpu.memory_space<vmem>>, vector<64x128xf32>
    %cst_92 = arith.constant dense<0.000000e+00> : vector<1x128xf32>
    %107 = tpu.matmul %105, %106, %cst_92 {dimension_numbers = #tpu.dot_dimension_numbers<[1], [0], [0], [1], [0, 0, 1, 1], [], []>} : vector<1x64xf32>, vector<64x128xf32>, vector<1x128xf32> -> vector<1x128xf32>
    %108 = arith.addf %104, %107 : vector<1x128xf32>
    %109 = vector.extract_strided_slice %97 {offsets = [3, 0], sizes = [1, 64], strides = [1, 1]} : vector<4x64xf32> to vector<1x64xf32>
    %c696 = arith.constant 696 : index
    %c0_93 = arith.constant 0 : index
    %110 = vector.load %arg2[%c696, %c0_93] : memref<904x128xf32, #tpu.memory_space<vmem>>, vector<64x128xf32>
    %cst_94 = arith.constant dense<0.000000e+00> : vector<1x128xf32>
    %111 = tpu.matmul %109, %110, %cst_94 {dimension_numbers = #tpu.dot_dimension_numbers<[1], [0], [0], [1], [0, 0, 1, 1], [], []>} : vector<1x64xf32>, vector<64x128xf32>, vector<1x128xf32> -> vector<1x128xf32>
    %112 = arith.addf %108, %111 : vector<1x128xf32>
    %c760 = arith.constant 760 : index
    %c0_95 = arith.constant 0 : index
    %113 = vector.load %arg2[%c760, %c0_95] : memref<904x128xf32, #tpu.memory_space<vmem>>, vector<1x128xf32>
    %114 = arith.addf %112, %113 : vector<1x128xf32>
    %cst_96 = arith.constant 0.000000e+00 : f32
    %115 = vector.broadcast %cst_96 : f32 to vector<1x128xf32>
    %116 = arith.maximumf %114, %115 : vector<1x128xf32>
    %c768 = arith.constant 768 : index
    %c0_97 = arith.constant 0 : index
    %117 = vector.load %arg2[%c768, %c0_97] : memref<904x128xf32, #tpu.memory_space<vmem>>, vector<128x16xf32>
    %cst_98 = arith.constant dense<0.000000e+00> : vector<1x16xf32>
    %118 = tpu.matmul %116, %117, %cst_98 {dimension_numbers = #tpu.dot_dimension_numbers<[1], [0], [0], [1], [0, 0, 1, 1], [], []>} : vector<1x128xf32>, vector<128x16xf32>, vector<1x16xf32> -> vector<1x16xf32>
    %c896 = arith.constant 896 : index
    %c0_99 = arith.constant 0 : index
    %119 = vector.load %arg2[%c896, %c0_99] : memref<904x128xf32, #tpu.memory_space<vmem>>, vector<1x16xf32>
    %120 = arith.addf %118, %119 : vector<1x16xf32>
    %c0_100 = arith.constant 0 : index
    %c0_101 = arith.constant 0 : index
    %c0_102 = arith.constant 0 : index
    %121 = vector.load %arg3[%c0_100, %c0_101, %c0_102] : memref<1x1x16xf32, #tpu.memory_space<vmem>>, vector<1x1x16xf32>
    %122 = vector.shape_cast %121 : vector<1x1x16xf32> to vector<1x16xf32>
    %123 = vector.shape_cast %120 : vector<1x16xf32> to vector<1x1x16xf32>
    tpu.vector_store %arg3[%c0_100, %c0_101, %c0_102], %123 {strides = array<i32>} : memref<1x1x16xf32, #tpu.memory_space<vmem>>, vector<1x1x16xf32>,
    return
  }
  func.func @transform_0(%arg0: i32) -> (i32, i32, i32) {
    %c0_i32 = arith.constant 0 : i32
    %c0_i32_0 = arith.constant 0 : i32
    %c0_i32_1 = arith.constant 0 : i32
    return %arg0, %c0_i32, %c0_i32_0 : i32, i32, i32
  }
  func.func @transform_1(%arg0: i32) -> (i32, i32) {
    %c0_i32 = arith.constant 0 : i32
    %c0_i32_0 = arith.constant 0 : i32
    %c0_i32_1 = arith.constant 0 : i32
    return %c0_i32, %c0_i32_0 : i32, i32
  }
  func.func @transform_2(%arg0: i32) -> (i32, i32, i32) {
    %c0_i32 = arith.constant 0 : i32
    %c0_i32_0 = arith.constant 0 : i32
    %c0_i32_1 = arith.constant 0 : i32
    return %arg0, %c0_i32, %c0_i32_0 : i32, i32, i32
  }
}

</mosaic_0001>

<bundles_post_ra>
// kernel: sunnet_forward.1
= control target key start
LH: loop header
LB: loop body
LE: loop exit
PB: predicated region body
PF: predicated region fallthrough
CT: control target
= control target key end

     0   :  { %s3399_s9 = smov 0   ;;  %s3997_s0 = inlined_call_operand.vmem [shape: f32[2,93,48], index: 0, kind: input, shape index: {}]   ;;  %s3998_s1 = inlined_call_operand.vmem [shape: f32[904,128], index: 1, kind: input, shape index: {}]   ;;  %s3999_s2 = inlined_call_operand.vmem [shape: f32[2,1,16], index: 2, kind: output, shape index: {}]  }
   0x1 LB: > { %s2564_s10 = sadd.s32 4294967295, %s3379_s9   ;;  %p2568_p0 = scmp.ge.s32.totalorder %s3379_s9, 1  ;;  %s3379_s9 = sphi %s3399_s9, %s12_s9  }
   0x2   : > { %p112_p1 = scmp.lt.s32.totalorder %s3379_s9, 3 }
   0x4   : > { %p113_p2 = pnand %p2568_p0, %p112_p1 }
   0x5   : > { %v170_v0 = vld [vmem:[%s3998_s1 + $0x30] sm:$0xff] (!%p113_p2)  ;;  %v171_v1 = vld [vmem:[%s3998_s1 + $0x38] sm:$0xff] (!%p113_p2)  ;;  %v172_v2 = vld [vmem:[%s3998_s1 + $0x40] sm:$0xff] (!%p113_p2)  ;;  %p132_p3 = scmp.lt.s32.totalorder (!%p113_p2), %s2564_s10, 1  ;;  %vm174_vm0 = vcmask (!%p113_p2), 261120   ;;  %vm336_vm1 = vcmask (!%p113_p2), 392192  }
   0x6   : > { %116 = sbr.rel (%p113_p2) target bundleno = 1273 (0x4f9), region = 28  ;;  %v3182_v3 = vpack.c.bf16 (!%p113_p2), %v171_v1, %v170_v0  ;;  %v173_v4 = vld [vmem:[%s3998_s1 + $0x48] sm:$0xff] (!%p113_p2)  ;;  %v152_v6 = vld [vmem:[%s3998_s1] sm:$0xff] (!%p113_p2)  ;;  %v154_v9 = vld [vmem:[%s3998_s1 + $0x10] sm:$0xff] (!%p113_p2)  ;;  %vm527_vm2 = vcmask (!%p113_p2), 122880   ;;  %v3381_v39 = vmov (!%p113_p2), 0.0  }
   0x7   : > { %v3186_v5 = vpack.c.bf16 (!%p113_p2), %v173_v4, %v172_v2  ;;  %v153_v7 = vld [vmem:[%s3998_s1 + $0x8] sm:$0xff] (!%p113_p2)  ;;  %v155_v10 = vld [vmem:[%s3998_s1 + $0x18] sm:$0xff] (!%p113_p2)  ;;  %v156_v15 = vld [vmem:[%s3998_s1 + $0x20] sm:$0xff] (!%p113_p2)  ;;  %528 = vst.msk [vmem:[#allocation2] sm:$0x1] (!%p113_p2), %vm527_vm2, %v3381_v39  ;;  %v3382_v45 = vmov (!%p113_p2), 0.0|0.0  }
   0x8   : > { %3183 = vmatprep.subr.bf16.mxu0 (!%p113_p2), %v3182_v3  ;;  %v3190_v8 = vpack.c.bf16 (!%p113_p2), %v153_v7, %v152_v6  ;;  %v3194_v14 = vpack.c.bf16 (!%p113_p2), %v155_v10, %v154_v9  ;;  %v157_v16 = vld [vmem:[%s3998_s1 + $0x28] sm:$0xff] (!%p113_p2)  ;;  %529 = vst.msk [vmem:[#allocation2 + $0x5d] sm:$0x1] (!%p113_p2), %vm527_vm2, %v3381_v39  ;;  %v558_v41 = vld [vmem:[%s3998_s1 + $0x70] sm:$0xff] (!%p113_p2)  ;;  %v549_v42 = vld [vmem:[%s3998_s1 + $0x58] sm:$0xff] (!%p113_p2)  ;;  %3205 = vmatprep.subr.bf16.mxu1 (!%p113_p2), %v3382_v45  ;;  %vm3383_vm3 = vmmov (!%p113_p2), 0  }
   0x9   : > { %3185 = vmatpush3.bf16.msra.mxu0 (!%p113_p2), %v3182_v3  ;;  %v3198_v19 = vpack.c.bf16 (!%p113_p2), %v157_v16, %v156_v15  ;;  %v557_v40 = vld [vmem:[%s3998_s1 + $0x68] sm:$0xff] (!%p113_p2)  ;;  %v550_v44 = vld [vmem:[%s3998_s1 + $0x60] sm:$0xff] (!%p113_p2)  ;;  %2883 = vmatprep.mubr.msk.f32.mxu1 (!%p113_p2), %vm3383_vm3, %v3381_v39  ;;  %v2594_v47 = vld [vmem:[%s3998_s1 + $0x50] ss:$0 sm:$0xff] (!%p113_p2)  ;;  %vm530_vm4 = vcmask (!%p113_p2), 130048   ;;  %vm542_vm5 = vcmask (!%p113_p2), 125952  }
   0xa   : > { %3187 = vmatprep.subr.bf16.mxu0 (!%p113_p2), %v3186_v5  ;;  %v3203_v43 = vpack.c.bf16 (!%p113_p2), %v558_v41, %v557_v40  ;;  %v3206_v46 = vpack.c.bf16 (!%p113_p2), %v550_v44, %v549_v42  ;;  %v743_v9 = vld [vmem:[%s3998_s1 + $0x78] sm:$0xff] (!%p113_p2)  ;;  %v744_v10 = vld [vmem:[%s3998_s1 + $0x80] sm:$0xff] (!%p113_p2)  ;;  %vm1448_vm6 = vcmask (!%p113_p2), 253952   ;;  %vm1453_vm7 = vcmask (!%p113_p2), 254976  }
   0xb   : > { %v944_v44 = vld [vmem:[%s3998_s1 + $0xa0] sm:$0xff] (!%p113_p2)  ;;  %1449 = vst.msk [vmem:[#allocation3] sm:$0x1] (!%p113_p2), %vm1448_vm6, %v3381_v39  ;;  %1450 = vst.msk [vmem:[#allocation3 + $0x13] sm:$0x1] (!%p113_p2), %vm1448_vm6, %v3381_v39  ;;  %vm2117_vm8 = vcmask (!%p113_p2), 523264  }
   0xc   : > { %3207 = vmatpush3.bf16.msra.mxu1 (!%p113_p2), %v3206_v46 }
   0xd   : > { %s4001_s10 = smov (!%p132_p3, %s2564_s10), 1  ;;  %3189 = vmatpush3.bf16.msra.mxu0 %v3186_v5  ;;  %3208 = vmatprep.subr.bf16.mxu1 %v3382_v45 }
   0xe   : > { %s3361_s23 = smul.u32 96, %s4001_s10  ;;  %3191 = vmatprep.subr.bf16.mxu0 %v3190_v8  ;;  %s139_s7 = scalar_lea.vmem %s3999_s2, %s4001_s10 }
  0x10   : > { %s3431_s26 = scalar_lea.vmem %s3997_s0, %s3361_s23 }
  0x11   : > { %v158_v11 = vld [vmem:[%s3431_s26 + $0x1] sm:$0xff]  ;;  %v159_v12 = vld [vmem:[%s3431_s26 + $0x9] sm:$0xff]  ;;  %v160_v13 = vld [vmem:[%s3431_s26 + $0x11] sm:$0xff] }
  0x12   : > { %2818 = vmatprep.mubr.msk.f32.mxu0 %vm174_vm0, %v158_v11  ;;  %v161_v17 = vld [vmem:[%s3431_s26 + $0x19] sm:$0xff]  ;;  %v162_v18 = vld [vmem:[%s3431_s26 + $0x21] sm:$0xff]  ;;  %v163_v20 = vld [vmem:[%s3431_s26 + $0x29] sm:$0xff] }
  0x13   : > { %2819 = vmatmul.mubr.msk.f32.vlgmr.msra.gmra.mrb[0].mxu0 %vm174_vm0, %v159_v12  ;;  %v164_v21 = vld [vmem:[%s3431_s26 + $0x31] sm:$0xff]  ;;  %v165_v22 = vld [vmem:[%s3431_s26 + $0x39] sm:$0xff]  ;;  %v166_v23 = vld [vmem:[%s3431_s26 + $0x41] sm:$0xff] }
  0x14   : > { %3193 = vmatpush3.bf16.msra.mxu0 %v3190_v8  ;;  %2821 = vmatprep.mubr.msk.f32.mxu0 %vm174_vm0, %v160_v13  ;;  %v167_v24 = vld [vmem:[%s3431_s26 + $0x49] sm:$0xff]  ;;  %v168_v25 = vld [vmem:[%s3431_s26 + $0x51] sm:$0xff]  ;;  %v169_v26 = vld [vmem:[%s3431_s26 + $0x59] sm:$0xf] }
  0x15   : > { %3195 = vmatprep.subr.bf16.mxu0 %v3194_v14  ;;  %v140_v27 = vld [vmem:[%s3431_s26] sm:$0xff]  ;;  %v141_v28 = vld [vmem:[%s3431_s26 + $0x8] sm:$0xff]  ;;  %v142_v29 = vld [vmem:[%s3431_s26 + $0x10] sm:$0xff] }
  0x16   : > { %v143_v30 = vld [vmem:[%s3431_s26 + $0x18] sm:$0xff]  ;;  %v144_v31 = vld [vmem:[%s3431_s26 + $0x20] sm:$0xff]  ;;  %v145_v32 = vld [vmem:[%s3431_s26 + $0x28] sm:$0xff] }
  0x17   : > { %2822 = vmatmul.mubr.msk.f32.gmra.mrb[2].mxu0 %vm174_vm0, %v161_v17  ;;  %v146_v33 = vld [vmem:[%s3431_s26 + $0x30] sm:$0xff]  ;;  %v147_v34 = vld [vmem:[%s3431_s26 + $0x38] sm:$0xff]  ;;  %v148_v35 = vld [vmem:[%s3431_s26 + $0x40] sm:$0xff]  ;;  %v3209_v17 = vpack.c.bf16 %v744_v10, %v743_v9 }
  0x18   : > { %2824 = vmatprep.mubr.msk.f32.mxu0 %vm174_vm0, %v162_v18  ;;  %3197 = vmatpush3.bf16.msra.mxu0 %v3194_v14  ;;  %v149_v36 = vld [vmem:[%s3431_s26 + $0x48] sm:$0xff]  ;;  %v150_v37 = vld [vmem:[%s3431_s26 + $0x50] sm:$0xff]  ;;  %v151_v38 = vld [vmem:[%s3431_s26 + $0x58] sm:$0xf] }
  0x19   : > { %3199 = vmatprep.subr.bf16.mxu0 %v3198_v19  ;;  %v1043_v13 = vld [vmem:[%s3998_s1 + $0xa8] sm:$0xff]  ;;  %v1044_v14 = vld [vmem:[%s3998_s1 + $0xb0] sm:$0xff]  ;;  %v1615_v10 = vld [vmem:[%s3998_s1 + $0x138] sm:$0xff] }
  0x1b   : > { %2825 = vmatmul.mubr.msk.f32.gmra.mrb[4].mxu0 %vm174_vm0, %v163_v20  ;;  %v3218_v20 = vpack.c.bf16 %v1044_v14, %v1043_v13  ;;  %v1465_v13 = vld [vmem:[%s3998_s1 + $0x128] sm:$0xff]  ;;  %v1616_v14 = vld [vmem:[%s3998_s1 + $0x140] sm:$0xff] }
  0x1c   : > { %2827 = vmatprep.mubr.msk.f32.mxu0 %vm174_vm0, %v164_v21  ;;  %3201 = vmatpush3.bf16.msra.mxu0 %v3198_v19 }
  0x1d   : > { %3202 = vmatprep.subr.bf16.mxu0 %v3382_v45 }
  0x1f   : > { %2828 = vmatmul.mubr.msk.f32.gmra.mrb[6].mxu0 %vm174_vm0, %v165_v22 }
  0x20   : > { %2830 = vmatprep.mubr.msk.f32.mxu0 %vm174_vm0, %v166_v23 }
  0x23   : > { %2831 = vmatmul.mubr.msk.f32.gmra.mrb[8].mxu0 %vm174_vm0, %v167_v24 }
  0x24   : > { %2833 = vmatprep.mubr.msk.f32.mxu0 %vm174_vm0, %v168_v25 }
  0x27   : > { %2834 = vmatmul.mubr.msk.f32.gmra.mrb[10].mxu0 %vm174_vm0, %v169_v26 }
  0x28   : > { %2848 = vmatprep.mubr.msk.f32.mxu0 %vm336_vm1, %v140_v27 }
  0x2b   : > { %2849 = vmatmul.mubr.msk.f32.vlgmr.msra.gmra.mrb[0].mxu0 %vm336_vm1, %v141_v28 }
  0x2c   : > { %2851 = vmatprep.mubr.msk.f32.mxu0 %vm336_vm1, %v142_v29  ;;  %3204 = vmatpush3.bf16.msra.mxu0 %v3203_v43  ;;  %v943_v43 = vld [vmem:[%s3998_s1 + $0x98] sm:$0xff] }
  0x2d   : > { %3217 = vmatprep.subr.bf16.mxu0 %v3382_v45 }
  0x2f   : > { %2852 = vmatmul.mubr.msk.f32.gmra.mrb[2].mxu0 %vm336_vm1, %v143_v30  ;;  %v843_v30 = vld [vmem:[%s3998_s1 + $0x88] sm:$0xff] }
  0x30   : > { %2854 = vmatprep.mubr.msk.f32.mxu0 %vm336_vm1, %v144_v31  ;;  %v844_v31 = vld [vmem:[%s3998_s1 + $0x90] sm:$0xff] }
  0x33   : > { %2855 = vmatmul.mubr.msk.f32.gmra.mrb[4].mxu0 %vm336_vm1, %v145_v32  ;;  %v1243_v32 = vld [vmem:[%s3998_s1 + $0xc8] sm:$0xff] }
  0x34   : > { %2857 = vmatprep.mubr.msk.f32.mxu0 %vm336_vm1, %v146_v33  ;;  %v1244_v33 = vld [vmem:[%s3998_s1 + $0xd0] sm:$0xff] }
  0x37   : > { %2858 = vmatmul.mubr.msk.f32.gmra.mrb[6].mxu0 %vm336_vm1, %v147_v34 }
  0x38   : > { %2860 = vmatprep.mubr.msk.f32.mxu0 %vm336_vm1, %v148_v35 }
  0x3b   : > { %2861 = vmatmul.mubr.msk.f32.gmra.mrb[8].mxu0 %vm336_vm1, %v149_v36  ;;  %v3212_v36 = vpack.c.bf16 %v844_v31, %v843_v30 }
  0x3c   : > { %2863 = vmatprep.mubr.msk.f32.mxu0 %vm336_vm1, %v150_v37  ;;  %v3224_v37 = vpack.c.bf16 %v1244_v33, %v1243_v32 }
  0x3f   : > { %2864 = vmatmul.mubr.msk.f32.gmra.mrb[10].mxu0 %vm336_vm1, %v151_v38 }
  0x40   : > { %2870 = vmatprep.mubr.msk.f32.mxu0 %vm3383_vm3, %v3381_v39 }
  0xfe   : > { %v2850_v48 = vpop.f32.mrb[0].mxu0 }
  0xff   : > { %v504_v49 = vadd.f32 %v2850_v48, %v2594_v47  ;;  %v439_v50 = vpop.f32.mrb[1].mxu0  ;;  %v3215_v48 = vpack.c.bf16 %v944_v44, %v943_v43 }
 0x100   : > { %v503_v51 = vadd.f32 %v2594_v47, %v439_v50 }
 0x101   : > { %v516_v52 = vmax.f32 %v504_v49, 0.0 }
 0x102   : > { %v515_v53 = vmax.f32 %v503_v51, 0.0  ;;  %v2853_v54 = vpop.f32.mrb[2].mxu0 }
 0x103   : > { %532 = vst.msk [vmem:[#allocation2 + $0x9] sm:$0xff] %vm530_vm4, %v516_v52  ;;  %v506_v55 = vadd.f32 %v2853_v54, %v2594_v47  ;;  %v449_v56 = vpop.f32.mrb[3].mxu0  ;;  %v1144_v54 = vld [vmem:[%s3998_s1 + $0xc0] sm:$0xff] }
 0x104   : > { %531 = vst.msk [vmem:[#allocation2 + $0x1] sm:$0xff] %vm530_vm4, %v515_v53  ;;  %v505_v57 = vadd.f32 %v2594_v47, %v449_v56  ;;  %v1143_v53 = vld [vmem:[%s3998_s1 + $0xb8] sm:$0xff] }
 0x105   : > { %v518_v58 = vmax.f32 %v506_v55, 0.0 }
 0x106   : > { %v517_v59 = vmax.f32 %v505_v57, 0.0  ;;  %v2856_v60 = vpop.f32.mrb[4].mxu0  ;;  %v3221_v57 = vpack.c.bf16 %v1144_v54, %v1143_v53 }
 0x107   : > { %534 = vst.msk [vmem:[#allocation2 + $0x19] sm:$0xff] %vm530_vm4, %v518_v58  ;;  %v508_v61 = vadd.f32 %v2856_v60, %v2594_v47  ;;  %v459_v62 = vpop.f32.mrb[5].mxu0  ;;  %v1343_v60 = vld [vmem:[%s3998_s1 + $0xd8] sm:$0xff] }
 0x108   : > { %533 = vst.msk [vmem:[#allocation2 + $0x11] sm:$0xff] %vm530_vm4, %v517_v59  ;;  %v507_v63 = vadd.f32 %v2594_v47, %v459_v62 }
 0x109   : > { %v520_v0 = vmax.f32 %v508_v61, 0.0  ;;  %v1344_v61 = vld [vmem:[%s3998_s1 + $0xe0] sm:$0xff] }
 0x10a   : > { %v519_v1 = vmax.f32 %v507_v63, 0.0  ;;  %v2859_v2 = vpop.f32.mrb[6].mxu0  ;;  %v3227_v63 = vpack.c.bf16 %v1344_v61, %v1343_v60 }
 0x10b   : > { %536 = vst.msk [vmem:[#allocation2 + $0x29] sm:$0xff] %vm530_vm4, %v520_v0  ;;  %v510_v3 = vadd.f32 %v2859_v2, %v2594_v47  ;;  %v469_v4 = vpop.f32.mrb[7].mxu0 }
 0x10c   : > { %535 = vst.msk [vmem:[#allocation2 + $0x21] sm:$0xff] %vm530_vm4, %v519_v1  ;;  %v509_v5 = vadd.f32 %v2594_v47, %v469_v4 }
 0x10d   : > { %v522_v6 = vmax.f32 %v510_v3, 0.0 }
 0x10e   : > { %v521_v7 = vmax.f32 %v509_v5, 0.0  ;;  %v2862_v8 = vpop.f32.mrb[8].mxu0 }
 0x10f   : > { %538 = vst.msk [vmem:[#allocation2 + $0x39] sm:$0xff] %vm530_vm4, %v522_v6  ;;  %v512_v11 = vadd.f32 %v2862_v8, %v2594_v47  ;;  %v479_v12 = vpop.f32.mrb[9].mxu0  ;;  %v1462_v6 = vld [vmem:[%s3998_s1 + $0x110] sm:$0xff] }
 0x110   : > { %537 = vst.msk [vmem:[#allocation2 + $0x31] sm:$0xff] %vm530_vm4, %v521_v7  ;;  %v511_v15 = vadd.f32 %v2594_v47, %v479_v12  ;;  %v1463_v7 = vld [vmem:[%s3998_s1 + $0x118] sm:$0xff]  ;;  %v1614_v8 = vld [vmem:[%s3998_s1 + $0x130] sm:$0xff]  ;;  %v1464_v12 = vld [vmem:[%s3998_s1 + $0x120] sm:$0xff] }
 0x111   : > { %v524_v16 = vmax.f32 %v512_v11, 0.0  ;;  %v3230_v9 = vpack.c.bf16 %v1463_v7, %v1462_v6  ;;  %v3242_v11 = vpack.c.bf16 %v1615_v10, %v1614_v8 }
 0x112   : > { %v523_v18 = vmax.f32 %v511_v15, 0.0  ;;  %v2865_v19 = vpop.f32.mrb[10].mxu0  ;;  %v3233_v15 = vpack.c.bf16 %v1465_v13, %v1464_v12 }
 0x113   : > { %540 = vst.msk [vmem:[#allocation2 + $0x49] sm:$0xff] %vm530_vm4, %v524_v16  ;;  %v514_v21 = vadd.f32 %v2865_v19, %v2594_v47  ;;  %v489_v22 = vpop.f32.mrb[11].mxu0  ;;  %v552_v23 = vld [vmem:[#allocation2 + $0x1] ss:$5 sm:$0xff]  ;;  %v544_v24 = vld [vmem:[#allocation2] ss:$5 sm:$0xff] }
 0x114   : > { %539 = vst.msk [vmem:[#allocation2 + $0x41] sm:$0xff] %vm530_vm4, %v523_v18  ;;  %v513_v25 = vadd.f32 %v2594_v47, %v489_v22  ;;  %2871 = vmatmul.mubr.msk.f32.vlgmr.msra.gmra.mrb[12].mxu0 %vm530_vm4, %v552_v23  ;;  %2884 = vmatmul.mubr.msk.f32.vlgmr.msra.gmra.mrb[0].mxu1 %vm530_vm4, %v544_v24  ;;  %v738_v38 = vld [vmem:[#allocation2 + $0x2] ss:$5 sm:$0xff]  ;;  %v838_v49 = vld [vmem:[#allocation2 + $0x3] ss:$5 sm:$0xff] }
 0x115   : > { %v526_v26 = vmax.f32 %v514_v21, 0.0  ;;  %3210 = vmatpush3.bf16.msra.mxu1 %v3209_v17  ;;  %2873 = vmatprep.mubr.msk.f32.mxu0 %vm3383_vm3, %v3381_v39  ;;  %v1038_v40 = vld [vmem:[#allocation2 + $0x5] ss:$5 sm:$0xff]  ;;  %v938_v58 = vld [vmem:[#allocation2 + $0x4] ss:$5 sm:$0xff] }
 0x116   : > { %v525_v27 = vmax.f32 %v513_v25, 0.0  ;;  %2886 = vmatprep.mubr.msk.f32.mxu1 %vm3383_vm3, %v3381_v39  ;;  %3219 = vmatpush3.bf16.msra.mxu0 %v3218_v20  ;;  %v1238_v50 = vld [vmem:[#allocation2 + $0x7] ss:$5 sm:$0xff]  ;;  %v1138_v0 = vld [vmem:[#allocation2 + $0x6] ss:$5 sm:$0xff] }
 0x117   : > { %543 = vst.msk [vmem:[#allocation2 + $0x59] sm:$0xf] %vm542_vm5, %v526_v26  ;;  %3211 = vmatprep.subr.bf16.mxu1 %v3382_v45  ;;  %3223 = vmatprep.subr.bf16.mxu0 %v3382_v45  ;;  %v1338_v3 = vld [vmem:[#allocation2 + $0x8] ss:$5 sm:$0xff] }
 0x118   : > { %541 = vst.msk [vmem:[#allocation2 + $0x51] sm:$0xff] %vm530_vm4, %v525_v27  ;;  %v1617_v16 = vld [vmem:[%s3998_s1 + $0x148] sm:$0xff] }
 0x119   : > { %v3245_v17 = vpack.c.bf16 %v1617_v16, %v1616_v14 }
 0x11b   : > { %v554_v28 = vld [vmem:[#allocation2 + $0x29] ss:$5 sm:$0xff]  ;;  %v546_v29 = vld [vmem:[#allocation2 + $0x28] ss:$5 sm:$0xff] }
 0x11c   : > { %2874 = vmatmul.mubr.msk.f32.gmra.mrb[14].mxu0 %vm530_vm4, %v554_v28  ;;  %2887 = vmatmul.mubr.msk.f32.gmra.mrb[2].mxu1 %vm530_vm4, %v546_v29  ;;  %v740_v41 = vld [vmem:[#allocation2 + $0x2a] ss:$5 sm:$0xff]  ;;  %v840_v51 = vld [vmem:[#allocation2 + $0x2b] ss:$5 sm:$0xff] }
 0x11d   : > { %2876 = vmatprep.mubr.msk.f32.mxu0 %vm3383_vm3, %v3381_v39  ;;  %2889 = vmatprep.mubr.msk.f32.mxu1 %vm3383_vm3, %v3381_v39  ;;  %v1040_v42 = vld [vmem:[#allocation2 + $0x2d] ss:$5 sm:$0xff]  ;;  %v940_v59 = vld [vmem:[#allocation2 + $0x2c] ss:$5 sm:$0xff] }
 0x11f   : > { %v556_v34 = vld [vmem:[#allocation2 + $0x51] ss:$5 sm:$0x3]  ;;  %v548_v35 = vld [vmem:[#allocation2 + $0x50] ss:$5 sm:$0x3] }
 0x120   : > { %2877 = vmatmul.mubr.msk.f32.gmra.mrb[16].mxu0 %vm530_vm4, %v556_v34  ;;  %2890 = vmatmul.mubr.msk.f32.gmra.mrb[4].mxu1 %vm530_vm4, %v548_v35  ;;  %v742_v46 = vld [vmem:[#allocation2 + $0x52] ss:$5 sm:$0x3]  ;;  %v1042_v47 = vld [vmem:[#allocation2 + $0x55] ss:$5 sm:$0x3] }
 0x121   : > { %2896 = vmatprep.mubr.msk.f32.mxu1 %vm3383_vm3, %v3381_v39  ;;  %2935 = vmatprep.mubr.msk.f32.mxu0 %vm3383_vm3, %v3381_v39  ;;  %v1240_v52 = vld [vmem:[#allocation2 + $0x2f] ss:$5 sm:$0xff]  ;;  %v842_v55 = vld [vmem:[#allocation2 + $0x53] ss:$5 sm:$0x3] }
 0x122   : > { %v1242_v56 = vld [vmem:[#allocation2 + $0x57] ss:$5 sm:$0x3]  ;;  %v942_v62 = vld [vmem:[#allocation2 + $0x54] ss:$5 sm:$0x3] }
 0x123   : > { %v1140_v1 = vld [vmem:[#allocation2 + $0x2e] ss:$5 sm:$0xff]  ;;  %v1142_v2 = vld [vmem:[#allocation2 + $0x56] ss:$5 sm:$0x3] }
 0x124   : > { %2897 = vmatmul.mubr.msk.f32.vlgmr.msra.gmra.mrb[6].mxu1 %vm530_vm4, %v738_v38  ;;  %2936 = vmatmul.mubr.msk.f32.vlgmr.msra.gmra.mrb[18].mxu0 %vm530_vm4, %v1038_v40  ;;  %v1340_v4 = vld [vmem:[#allocation2 + $0x30] ss:$5 sm:$0xff]  ;;  %v1342_v5 = vld [vmem:[#allocation2 + $0x58] ss:$5 sm:$0x3] }
 0x125   : > { %3213 = vmatpush3.bf16.msra.mxu1 %v3212_v36  ;;  %2899 = vmatprep.mubr.msk.f32.mxu1 %vm3383_vm3, %v3381_v39 }
 0x126   : > { %2938 = vmatprep.mubr.msk.f32.mxu0 %vm3383_vm3, %v3381_v39  ;;  %3225 = vmatpush3.bf16.msra.mxu0 %v3224_v37 }
 0x127   : > { %3214 = vmatprep.subr.bf16.mxu1 %v3382_v45  ;;  %3229 = vmatprep.subr.bf16.mxu0 %v3382_v45 }
 0x128   : > { %2900 = vmatmul.mubr.msk.f32.gmra.mrb[8].mxu1 %vm530_vm4, %v740_v41  ;;  %2939 = vmatmul.mubr.msk.f32.gmra.mrb[20].mxu0 %vm530_vm4, %v1040_v42 }
 0x129   : > { %2902 = vmatprep.mubr.msk.f32.mxu1 %vm3383_vm3, %v3381_v39  ;;  %2941 = vmatprep.mubr.msk.f32.mxu0 %vm3383_vm3, %v3381_v39 }
 0x12c   : > { %2903 = vmatmul.mubr.msk.f32.gmra.mrb[10].mxu1 %vm530_vm4, %v742_v46  ;;  %2942 = vmatmul.mubr.msk.f32.gmra.mrb[22].mxu0 %vm530_vm4, %v1042_v47 }
 0x12d   : > { %2909 = vmatprep.mubr.msk.f32.mxu1 %vm3383_vm3, %v3381_v39  ;;  %2961 = vmatprep.mubr.msk.f32.mxu0 %vm3383_vm3, %v3381_v39 }
 0x130   : > { %2910 = vmatmul.mubr.msk.f32.vlgmr.msra.gmra.mrb[12].mxu1 %vm530_vm4, %v838_v49  ;;  %2962 = vmatmul.mubr.msk.f32.vlgmr.msra.gmra.mrb[24].mxu0 %vm530_vm4, %v1238_v50 }
 0x131   : > { %3216 = vmatpush3.bf16.msra.mxu1 %v3215_v48  ;;  %2912 = vmatprep.mubr.msk.f32.mxu1 %vm3383_vm3, %v3381_v39 }
 0x132   : > { %2964 = vmatprep.mubr.msk.f32.mxu0 %vm3383_vm3, %v3381_v39  ;;  %3220 = vmatprep.subr.bf16.mxu1 %v3382_v45 }
 0x133   : > { %3231 = vmatpush3.bf16.msra.mxu0 %v3230_v9 }
 0x134   : > { %2913 = vmatmul.mubr.msk.f32.gmra.mrb[14].mxu1 %vm530_vm4, %v840_v51  ;;  %2965 = vmatmul.mubr.msk.f32.gmra.mrb[26].mxu0 %vm530_vm4, %v1240_v52 }
 0x135   : > { %2915 = vmatprep.mubr.msk.f32.mxu1 %vm3383_vm3, %v3381_v39  ;;  %2967 = vmatprep.mubr.msk.f32.mxu0 %vm3383_vm3, %v3381_v39 }
 0x136   : > { %3232 = vmatprep.subr.bf16.mxu0 %v3382_v45 }
 0x137   : > { %3234 = vmatpush3.bf16.msra.mxu0 %v3233_v15 }
 0x138   : > { %2916 = vmatmul.mubr.msk.f32.gmra.mrb[16].mxu1 %vm530_vm4, %v842_v55  ;;  %2968 = vmatmul.mubr.msk.f32.gmra.mrb[28].mxu0 %vm530_vm4, %v1242_v56 }
 0x139   : > { %2922 = vmatprep.mubr.msk.f32.mxu1 %vm3383_vm3, %v3381_v39  ;;  %2991 = vmatprep.mubr.msk.f32.mxu0 %vm3383_vm3, %v3381_v39 }
 0x13a   : > { %3235 = vmatprep.subr.bf16.mxu0 %v3382_v45 }
 0x13c   : > { %2923 = vmatmul.mubr.msk.f32.vlgmr.msra.gmra.mrb[18].mxu1 %vm530_vm4, %v938_v58 }
 0x13d   : > { %3222 = vmatpush3.bf16.msra.mxu1 %v3221_v57  ;;  %2925 = vmatprep.mubr.msk.f32.mxu1 %vm3383_vm3, %v3381_v39 }
 0x13e   : > { %3226 = vmatprep.subr.bf16.mxu1 %v3382_v45 }
 0x140   : > { %2926 = vmatmul.mubr.msk.f32.gmra.mrb[20].mxu1 %vm530_vm4, %v940_v59 }
 0x141   : > { %2928 = vmatprep.mubr.msk.f32.mxu1 %vm3383_vm3, %v3381_v39 }
 0x144   : > { %2929 = vmatmul.mubr.msk.f32.gmra.mrb[22].mxu1 %vm530_vm4, %v942_v62 }
 0x145   : > { %2948 = vmatprep.mubr.msk.f32.mxu1 %vm3383_vm3, %v3381_v39 }
 0x148   : > { %2949 = vmatmul.mubr.msk.f32.vlgmr.msra.gmra.mrb[24].mxu1 %vm530_vm4, %v1138_v0 }
 0x149   : > { %3228 = vmatpush3.bf16.msra.mxu1 %v3227_v63  ;;  %2951 = vmatprep.mubr.msk.f32.mxu1 %vm3383_vm3, %v3381_v39 }
 0x14a   : > { %3241 = vmatprep.subr.bf16.mxu1 %v3382_v45 }
 0x14c   : > { %2952 = vmatmul.mubr.msk.f32.gmra.mrb[26].mxu1 %vm530_vm4, %v1140_v1 }
 0x14d   : > { %2954 = vmatprep.mubr.msk.f32.mxu1 %vm3383_vm3, %v3381_v39 }
 0x150   : > { %2955 = vmatmul.mubr.msk.f32.gmra.mrb[28].mxu1 %vm530_vm4, %v1142_v2 }
 0x151   : > { %2974 = vmatprep.mubr.msk.f32.mxu1 %vm3383_vm3, %v3381_v39 }
 0x154   : > { %2975 = vmatmul.mubr.msk.f32.vlgmr.msra.gmra.mrb[30].mxu1 %vm530_vm4, %v1338_v3 }
 0x155   : > { %2977 = vmatprep.mubr.msk.f32.mxu1 %vm3383_vm3, %v3381_v39  ;;  %3243 = vmatpush3.bf16.msra.mxu1 %v3242_v11 }
 0x156   : > { %3244 = vmatprep.subr.bf16.mxu1 %v3382_v45 }
 0x158   : > { %2978 = vmatmul.mubr.msk.f32.gmra.mrb[32].mxu1 %vm530_vm4, %v1340_v4 }
 0x159   : > { %2980 = vmatprep.mubr.msk.f32.mxu1 %vm3383_vm3, %v3381_v39  ;;  %3246 = vmatpush3.bf16.msra.mxu1 %v3245_v17 }
 0x15a   : > { %3253 = vmatprep.subr.bf16.mxu1 %v3382_v45 }
 0x15c   : > { %2981 = vmatmul.mubr.msk.f32.gmra.mrb[34].mxu1 %vm530_vm4, %v1342_v5 }
 0x15d   : > { %3013 = vmatprep.mubr.msk.f32.mxu1 %vm3383_vm3, %v3381_v39 }
 0x1e7   : > { %v634_v18 = vpop.f32.mrb[12].mxu0  ;;  %v723_v19 = vpop.f32.mrb[0].mxu1 }
 0x1e8   : > { %v724_v20 = vadd.f32 %v723_v19, %v634_v18  ;;  %v2872_v21 = vpop.f32.mrb[13].mxu0  ;;  %v2885_v22 = vpop.f32.mrb[1].mxu1 }
 0x1ef   : > { %v639_v23 = vpop.f32.mrb[14].mxu0  ;;  %v728_v24 = vpop.f32.mrb[2].mxu1 }
 0x1f0   : > { %v729_v25 = vadd.f32 %v728_v24, %v639_v23  ;;  %v2875_v26 = vpop.f32.mrb[15].mxu0  ;;  %v2888_v27 = vpop.f32.mrb[3].mxu1 }
 0x1f1   : > { %v2622_v26 = vld [vmem:[%s3998_s1 + $0xe8] ss:$0 sm:$0xff] }
 0x1f3   : > { %v644_v28 = vpop.f32.mrb[16].mxu0  ;;  %v733_v29 = vpop.f32.mrb[4].mxu1 }
 0x1f4   : > { %v734_v30 = vadd.f32 %v733_v29, %v644_v28  ;;  %v2878_v31 = vpop.f32.mrb[17].mxu0  ;;  %v2891_v32 = vpop.f32.mrb[5].mxu1 }
 0x1f7   : > { %v820_v33 = vpop.f32.mrb[6].mxu1  ;;  %v1120_v34 = vpop.f32.mrb[18].mxu0 }
 0x1f8   : > { %v834_v35 = vadd.f32 %v820_v33, %v724_v20  ;;  %v2898_v36 = vpop.f32.mrb[7].mxu1  ;;  %v2937_v37 = vpop.f32.mrb[19].mxu0 }
 0x1fb   : > { %v825_v38 = vpop.f32.mrb[8].mxu1  ;;  %v1125_v40 = vpop.f32.mrb[20].mxu0 }
 0x1fc   : > { %v835_v41 = vadd.f32 %v825_v38, %v729_v25  ;;  %v2901_v42 = vpop.f32.mrb[9].mxu1  ;;  %v2940_v43 = vpop.f32.mrb[21].mxu0 }
 0x1fd   : > { %v1457_v43 = vld [vmem:[%s3998_s1 + $0xf8] sm:$0xff] }
 0x1ff   : > { %v830_v44 = vpop.f32.mrb[10].mxu1  ;;  %v1130_v46 = vpop.f32.mrb[22].mxu0 }
 0x200   : > { %v836_v47 = vadd.f32 %v830_v44, %v734_v30  ;;  %v2904_v48 = vpop.f32.mrb[11].mxu1  ;;  %v2943_v49 = vpop.f32.mrb[23].mxu0  ;;  %v1774_v44 = vld [vmem:[%s3998_s1 + $0x170] sm:$0xff] }
 0x201   : > { %v1458_v49 = vld [vmem:[%s3998_s1 + $0x100] sm:$0xff] }
 0x203   : > { %v920_v50 = vpop.f32.mrb[12].mxu1  ;;  %v1320_v51 = vpop.f32.mrb[24].mxu0 }
 0x204   : > { %v934_v52 = vadd.f32 %v920_v50, %v834_v35  ;;  %v2911_v53 = vpop.f32.mrb[13].mxu1  ;;  %v2963_v54 = vpop.f32.mrb[25].mxu0  ;;  %v1459_v50 = vld [vmem:[%s3998_s1 + $0x108] sm:$0xff] }
 0x207   : > { %v925_v55 = vpop.f32.mrb[14].mxu1  ;;  %v1325_v56 = vpop.f32.mrb[26].mxu0 }
 0x208   : > { %v935_v57 = vadd.f32 %v925_v55, %v835_v41  ;;  %v2914_v58 = vpop.f32.mrb[15].mxu1  ;;  %v2966_v59 = vpop.f32.mrb[27].mxu0  ;;  %v1456_v41 = vld [vmem:[%s3998_s1 + $0xf0] sm:$0xff]  ;;  %v3239_v55 = vpack.c.bf16 %v1459_v50, %v1458_v49 }
 0x209   : > { %v1695_v58 = vld [vmem:[%s3998_s1 + $0x158] sm:$0xff]  ;;  %v1934_v59 = vld [vmem:[%s3998_s1 + $0x1b0] sm:$0xff] }
 0x20b   : > { %v930_v60 = vpop.f32.mrb[16].mxu1  ;;  %v1330_v61 = vpop.f32.mrb[28].mxu0 }
 0x20c   : > { %v936_v62 = vadd.f32 %v930_v60, %v836_v47  ;;  %v2917_v63 = vpop.f32.mrb[17].mxu1  ;;  %v2969_v0 = vpop.f32.mrb[29].mxu0  ;;  %v3236_v47 = vpack.c.bf16 %v1457_v43, %v1456_v41  ;;  %v1935_v60 = vld [vmem:[%s3998_s1 + $0x1b8] sm:$0xff]  ;;  %v2106_v43 = vld [vmem:[%s3998_s1 + $0x230] sm:$0xff] }
 0x20d   : > { %v1696_v63 = vld [vmem:[%s3998_s1 + $0x160] sm:$0xff]  ;;  %v1697_v0 = vld [vmem:[%s3998_s1 + $0x168] sm:$0xff] }
 0x20f   : > { %v1020_v1 = vpop.f32.mrb[18].mxu1 }
 0x210   : > { %v1034_v2 = vadd.f32 %v1020_v1, %v934_v52  ;;  %v2924_v3 = vpop.f32.mrb[19].mxu1  ;;  %v1777_v52 = vld [vmem:[%s3998_s1 + $0x188] sm:$0xff]  ;;  %v1936_v1 = vld [vmem:[%s3998_s1 + $0x1c0] sm:$0xff] }
 0x212   : > { %v1134_v4 = vadd.f32 %v1120_v34, %v1034_v2  ;;  %v1937_v2 = vld [vmem:[%s3998_s1 + $0x1c8] sm:$0xff] }
 0x213   : > { %v1025_v5 = vpop.f32.mrb[20].mxu1 }
 0x214   : > { %v1035_v6 = vadd.f32 %v1025_v5, %v935_v57  ;;  %v2927_v7 = vpop.f32.mrb[21].mxu1  ;;  %v1694_v57 = vld [vmem:[%s3998_s1 + $0x150] sm:$0xff]  ;;  %v3251_v5 = vpack.c.bf16 %v1697_v0, %v1696_v63 }
 0x215   : > { %v1854_v7 = vld [vmem:[%s3998_s1 + $0x190] sm:$0xff] }
 0x216   : > { %v1135_v8 = vadd.f32 %v1125_v40, %v1035_v6  ;;  %v3269_v6 = vpack.c.bf16 %v1937_v2, %v1936_v1 }
 0x217   : > { %v1030_v9 = vpop.f32.mrb[22].mxu1 }
 0x218   : > { %v1036_v10 = vadd.f32 %v1030_v9, %v936_v62  ;;  %v2930_v11 = vpop.f32.mrb[23].mxu1  ;;  %v3266_v62 = vpack.c.bf16 %v1935_v60, %v1934_v59 }
 0x219   : > { %v1857_v11 = vld [vmem:[%s3998_s1 + $0x1a8] sm:$0xff] }
 0x21a   : > { %v1136_v12 = vadd.f32 %v1130_v46, %v1036_v10  ;;  %v1775_v46 = vld [vmem:[%s3998_s1 + $0x178] sm:$0xff]  ;;  %v1856_v10 = vld [vmem:[%s3998_s1 + $0x1a0] sm:$0xff] }
 0x21b   : > { %v1220_v13 = vpop.f32.mrb[24].mxu1  ;;  %v3254_v48 = vpack.c.bf16 %v1775_v46, %v1774_v44  ;;  %v2113_v46 = vld [vmem:[%s3998_s1 + $0x268] sm:$0xff] }
 0x21c   : > { %v1234_v14 = vadd.f32 %v1220_v13, %v1134_v4  ;;  %v2950_v15 = vpop.f32.mrb[25].mxu1 }
 0x21d   : > { %v2014_v15 = vld [vmem:[%s3998_s1 + $0x1d0] sm:$0xff] }
 0x21e   : > { %v1334_v16 = vadd.f32 %v1320_v51, %v1234_v14  ;;  %v1776_v51 = vld [vmem:[%s3998_s1 + $0x180] sm:$0xff]  ;;  %v3263_v14 = vpack.c.bf16 %v1857_v11, %v1856_v10 }
 0x21f   : > { %v1225_v17 = vpop.f32.mrb[26].mxu1  ;;  %v2345_v10 = vld [vmem:[%s3998_s1 + $0x2c0] sm:$0xff] }
 0x220   : > { %v1235_v18 = vadd.f32 %v1225_v17, %v1135_v8  ;;  %v2953_v19 = vpop.f32.mrb[27].mxu1  ;;  %v1855_v8 = vld [vmem:[%s3998_s1 + $0x198] sm:$0xff] }
 0x221   : > { %v3260_v9 = vpack.c.bf16 %v1855_v8, %v1854_v7  ;;  %v2017_v19 = vld [vmem:[%s3998_s1 + $0x1e8] sm:$0xff] }
 0x222   : > { %v1335_v20 = vadd.f32 %v1325_v56, %v1235_v18  ;;  %v3257_v56 = vpack.c.bf16 %v1777_v52, %v1776_v51  ;;  %v2016_v18 = vld [vmem:[%s3998_s1 + $0x1e0] sm:$0xff] }
 0x223   : > { %v1230_v21 = vpop.f32.mrb[28].mxu1 }
 0x224   : > { %v1236_v22 = vadd.f32 %v1230_v21, %v1136_v12  ;;  %v2956_v23 = vpop.f32.mrb[29].mxu1  ;;  %v3275_v21 = vpack.c.bf16 %v2017_v19, %v2016_v18 }
 0x225   : > { %v2099_v23 = vld [vmem:[%s3998_s1 + $0x1f8] sm:$0xff] }
 0x226   : > { %v1336_v24 = vadd.f32 %v1330_v61, %v1236_v22  ;;  %v3248_v61 = vpack.c.bf16 %v1695_v58, %v1694_v57 }
 0x227   : > { %v1420_v25 = vpop.f32.mrb[30].mxu1 }
 0x228   : > { %v1434_v27 = vadd.f32 %v1420_v25, %v1334_v16  ;;  %v2976_v28 = vpop.f32.mrb[31].mxu1  ;;  %v2015_v16 = vld [vmem:[%s3998_s1 + $0x1d8] sm:$0xff] }
 0x229   : > { %v3272_v17 = vpack.c.bf16 %v2015_v16, %v2014_v15  ;;  %v2101_v28 = vld [vmem:[%s3998_s1 + $0x208] sm:$0xff] }
 0x22a   : > { %v1442_v29 = vadd.f32 %v2622_v26, %v1434_v27  ;;  %v2108_v27 = vld [vmem:[%s3998_s1 + $0x240] sm:$0xff]  ;;  %v2346_v16 = vld [vmem:[%s3998_s1 + $0x2c8] sm:$0xff] }
 0x22b   : > { %v1425_v30 = vpop.f32.mrb[32].mxu1 }
 0x22c   : > { %v1445_v31 = vmax.f32 %v1442_v29, 0.0  ;;  %v1435_v32 = vadd.f32 %v1425_v30, %v1335_v20  ;;  %v2979_v33 = vpop.f32.mrb[33].mxu1  ;;  %v2102_v30 = vld [vmem:[%s3998_s1 + $0x210] sm:$0xff] }
 0x22d   : > { %v3293_v33 = vpack.c.bf16 %v2102_v30, %v2101_v28  ;;  %v2351_v30 = vld [vmem:[%s3998_s1 + $0x2f0] sm:$0xff] }
 0x22e   : > { %1451 = vst.msk [vmem:[#allocation3 + $0x1] sm:$0xff] %vm174_vm0, %v1445_v31  ;;  %v1443_v34 = vadd.f32 %v2622_v26, %v1435_v32  ;;  %v2109_v31 = vld [vmem:[%s3998_s1 + $0x248] sm:$0xff]  ;;  %v2110_v32 = vld [vmem:[%s3998_s1 + $0x250] sm:$0xff] }
 0x22f   : > { %v1430_v35 = vpop.f32.mrb[34].mxu1 }
 0x230   : > { %v1446_v36 = vmax.f32 %v1443_v34, 0.0  ;;  %v1436_v37 = vadd.f32 %v1430_v35, %v1336_v24  ;;  %v2982_v38 = vpop.f32.mrb[35].mxu1  ;;  %v2100_v24 = vld [vmem:[%s3998_s1 + $0x200] sm:$0xff]  ;;  %v2103_v34 = vld [vmem:[%s3998_s1 + $0x218] sm:$0xff] }
 0x231   : > { %v3290_v25 = vpack.c.bf16 %v2100_v24, %v2099_v23  ;;  %v2104_v35 = vld [vmem:[%s3998_s1 + $0x220] sm:$0xff]  ;;  %v2111_v38 = vld [vmem:[%s3998_s1 + $0x258] sm:$0xff] }
 0x232   : > { %1452 = vst.msk [vmem:[#allocation3 + $0x9] sm:$0xff] %vm174_vm0, %v1446_v36  ;;  %v1444_v40 = vadd.f32 %v2622_v26, %v1436_v37  ;;  %v2107_v26 = vld [vmem:[%s3998_s1 + $0x238] sm:$0xff]  ;;  %v3281_v36 = vpack.c.bf16 %v2110_v32, %v2109_v31  ;;  %v3296_v37 = vpack.c.bf16 %v2104_v35, %v2103_v34  ;;  %v2349_v24 = vld [vmem:[%s3998_s1 + $0x2e0] sm:$0xff]  ;;  %v2268_v32 = vld [vmem:[%s3998_s1 + $0x2a8] sm:$0xff] }
 0x233   : > { %v3278_v29 = vpack.c.bf16 %v2108_v27, %v2107_v26  ;;  %v2348_v23 = vld [vmem:[%s3998_s1 + $0x2d8] sm:$0xff]  ;;  %v2267_v27 = vld [vmem:[%s3998_s1 + $0x2a0] sm:$0xff] }
 0x234   : > { %v1447_v42 = vmax.f32 %v1444_v40, 0.0  ;;  %v2112_v40 = vld [vmem:[%s3998_s1 + $0x260] sm:$0xff]  ;;  %v2266_v26 = vld [vmem:[%s3998_s1 + $0x298] sm:$0xff]  ;;  %v3320_v28 = vpack.c.bf16 %v2349_v24, %v2348_v23 }
 0x235   : > { %v3284_v41 = vpack.c.bf16 %v2112_v40, %v2111_v38  ;;  %v3308_v31 = vpack.c.bf16 %v2267_v27, %v2266_v26 }
 0x236   : > { %1454 = vst.msk [vmem:[#allocation3 + $0x11] sm:$0x3] %vm1453_vm7, %v1447_v42  ;;  %v2105_v42 = vld [vmem:[%s3998_s1 + $0x228] sm:$0xff] }
 0x237   : > { %v3299_v44 = vpack.c.bf16 %v2106_v43, %v2105_v42  ;;  %v2431_v42 = vld [vmem:[%s3998_s1 + $0x310] sm:$0xff]  ;;  %v2432_v43 = vld [vmem:[%s3998_s1 + $0x318] sm:$0xff] }
 0x239   : > { %v1461_v53 = vld [vmem:[#allocation3 + $0x1] ss:$4 sm:$0xf]  ;;  %v1613_v54 = vld [vmem:[#allocation3 + $0x2] ss:$4 sm:$0xf] }
 0x23a   : > { %2992 = vmatmul.mubr.msk.f32.vlgmr.msra.gmra.mrb[30].mxu0 %vm174_vm0, %v1461_v53  ;;  %3014 = vmatmul.mubr.msk.f32.vlgmr.msra.gmra.mrb[36].mxu1 %vm174_vm0, %v1613_v54  ;;  %v1455_v3 = vld [vmem:[#allocation3] ss:$4 sm:$0xf]  ;;  %v1693_v12 = vld [vmem:[#allocation3 + $0x3] ss:$4 sm:$0xf] }
 0x23b   : > { %3237 = vmatpush3.bf16.msra.mxu0 %v3236_v47  ;;  %3255 = vmatpush3.bf16.msra.mxu1 %v3254_v48  ;;  %v1773_v4 = vld [vmem:[#allocation3 + $0x4] ss:$4 sm:$0xf]  ;;  %v2013_v22 = vld [vmem:[#allocation3 + $0x7] ss:$4 sm:$0xf] }
 0x23c   : > { %3238 = vmatprep.subr.bf16.mxu0 %v3382_v45  ;;  %3256 = vmatprep.subr.bf16.mxu1 %v3382_v45  ;;  %v2114_v47 = vld [vmem:[%s3998_s1 + $0x270] sm:$0xff] }
 0x23d   : > { %3002 = vmatprep.mubr.msk.f32.mxu0 %vm3383_vm3, %v3381_v39  ;;  %3035 = vmatprep.mubr.msk.f32.mxu1 %vm3383_vm3, %v3381_v39  ;;  %v1933_v13 = vld [vmem:[#allocation3 + $0x6] ss:$4 sm:$0xf]  ;;  %v1853_v20 = vld [vmem:[#allocation3 + $0x5] ss:$4 sm:$0xf]  ;;  %v3287_v48 = vpack.c.bf16 %v2114_v47, %v2113_v46 }
 0x23e   : > { %v2433_v46 = vld [vmem:[%s3998_s1 + $0x320] sm:$0xff]  ;;  %v2434_v47 = vld [vmem:[%s3998_s1 + $0x328] sm:$0xff] }
 0x23f   : > { %3240 = vmatpush3.bf16.msra.mxu0 %v3239_v55  ;;  %3258 = vmatpush3.bf16.msra.mxu1 %v3257_v56 }
 0x240   : > { %3247 = vmatprep.subr.bf16.mxu0 %v3382_v45  ;;  %3265 = vmatprep.subr.bf16.mxu1 %v3382_v45 }
 0x242   : > { %3003 = vmatmul.mubr.msk.f32.vlgmr.msra.gmra.mrb[32].mxu0 %vm174_vm0, %v1455_v3  ;;  %3036 = vmatmul.mubr.msk.f32.vlgmr.msra.gmra.mrb[38].mxu1 %vm174_vm0, %v1773_v4 }
 0x243   : > { %3249 = vmatpush3.bf16.msra.mxu0 %v3248_v61  ;;  %3267 = vmatpush3.bf16.msra.mxu1 %v3266_v62 }
 0x244   : > { %3250 = vmatprep.subr.bf16.mxu0 %v3382_v45  ;;  %3268 = vmatprep.subr.bf16.mxu1 %v3382_v45 }
 0x245   : > { %3024 = vmatprep.mubr.msk.f32.mxu0 %vm3383_vm3, %v3381_v39  ;;  %3057 = vmatprep.mubr.msk.f32.mxu1 %vm3383_vm3, %v3381_v39 }
 0x247   : > { %3252 = vmatpush3.bf16.msra.mxu0 %v3251_v5  ;;  %3270 = vmatpush3.bf16.msra.mxu1 %v3269_v6  ;;  %v2631_v6 = vld [vmem:[%s3998_s1 + $0x1f0] ss:$0 sm:$0xff] }
 0x248   : > { %3259 = vmatprep.subr.bf16.mxu0 %v3382_v45  ;;  %3277 = vmatprep.subr.bf16.mxu1 %v3382_v45 }
 0x24a   : > { %3025 = vmatmul.mubr.msk.f32.vlgmr.msra.gmra.mrb[34].mxu0 %vm174_vm0, %v1693_v12  ;;  %3058 = vmatmul.mubr.msk.f32.vlgmr.msra.gmra.mrb[40].mxu1 %vm174_vm0, %v1933_v13  ;;  %v2262_v12 = vld [vmem:[%s3998_s1 + $0x278] sm:$0xff]  ;;  %v2263_v13 = vld [vmem:[%s3998_s1 + $0x280] sm:$0xff] }
 0x24b   : > { %3261 = vmatpush3.bf16.msra.mxu0 %v3260_v9  ;;  %3046 = vmatprep.mubr.msk.f32.mxu0 %vm3383_vm3, %v3381_v39  ;;  %v2344_v9 = vld [vmem:[%s3998_s1 + $0x2b8] sm:$0xff]  ;;  %v3302_v18 = vpack.c.bf16 %v2263_v13, %v2262_v12  ;;  %v2445_v12 = vld [vmem:[%s3998_s1 + $0x380] sm:$0x1] }
 0x24c   : > { %3262 = vmatprep.subr.bf16.mxu0 %v3382_v45  ;;  %3087 = vmatprep.mubr.msk.f32.mxu1 %vm3383_vm3, %v3381_v39 }
 0x24d   : > { %3279 = vmatpush3.bf16.msra.mxu1 %v3278_v29  ;;  %v2350_v29 = vld [vmem:[%s3998_s1 + $0x2e8] sm:$0xff] }
 0x24e   : > { %3280 = vmatprep.subr.bf16.mxu1 %v3382_v45  ;;  %v3323_v34 = vpack.c.bf16 %v2351_v30, %v2350_v29 }
 0x24f   : > { %3264 = vmatpush3.bf16.msra.mxu0 %v3263_v14  ;;  %v3314_v14 = vpack.c.bf16 %v2345_v10, %v2344_v9 }
 0x250   : > { %3271 = vmatprep.subr.bf16.mxu0 %v3382_v45 }
 0x251   : > { %3282 = vmatpush3.bf16.msra.mxu1 %v3281_v36  ;;  %v2429_v36 = vld [vmem:[%s3998_s1 + $0x300] sm:$0xff] }
 0x252   : > { %3047 = vmatmul.mubr.msk.f32.vlgmr.msra.gmra.mrb[36].mxu0 %vm174_vm0, %v1853_v20  ;;  %3283 = vmatprep.subr.bf16.mxu1 %v3382_v45  ;;  %v2264_v20 = vld [vmem:[%s3998_s1 + $0x288] sm:$0xff] }
 0x253   : > { %3273 = vmatpush3.bf16.msra.mxu0 %v3272_v17  ;;  %3068 = vmatprep.mubr.msk.f32.mxu0 %vm3383_vm3, %v3381_v39  ;;  %v2347_v17 = vld [vmem:[%s3998_s1 + $0x2d0] sm:$0xff] }
 0x254   : > { %3274 = vmatprep.subr.bf16.mxu0 %v3382_v45 }
 0x255   : > { %3285 = vmatpush3.bf16.msra.mxu1 %v3284_v41 }
 0x256   : > { %3286 = vmatprep.subr.bf16.mxu1 %v3382_v45 }
 0x257   : > { %3276 = vmatpush3.bf16.msra.mxu0 %v3275_v21  ;;  %v2265_v21 = vld [vmem:[%s3998_s1 + $0x290] sm:$0xff] }
 0x258   : > { %3289 = vmatprep.subr.bf16.mxu0 %v3382_v45 }
 0x259   : > { %3288 = vmatpush3.bf16.msra.mxu1 %v3287_v48  ;;  %v2435_v48 = vld [vmem:[%s3998_s1 + $0x330] sm:$0xff] }
 0x25a   : > { %3069 = vmatmul.mubr.msk.f32.vlgmr.msra.gmra.mrb[38].mxu0 %vm174_vm0, %v2013_v22  ;;  %3301 = vmatprep.subr.bf16.mxu1 %v3382_v45  ;;  %v3317_v22 = vpack.c.bf16 %v2347_v17, %v2346_v16 }
 0x25b   : > { %3106 = vmatprep.mubr.msk.f32.mxu0 %vm3383_vm3, %v3381_v39  ;;  %3291 = vmatpush3.bf16.msra.mxu0 %v3290_v25  ;;  %v3305_v25 = vpack.c.bf16 %v2265_v21, %v2264_v20 }
 0x25c   : > { %3292 = vmatprep.subr.bf16.mxu0 %v3382_v45 }
 0x25f   : > { %3294 = vmatpush3.bf16.msra.mxu0 %v3293_v33  ;;  %v2269_v33 = vld [vmem:[%s3998_s1 + $0x2b0] sm:$0xff] }
 0x260   : > { %3295 = vmatprep.subr.bf16.mxu0 %v3382_v45  ;;  %v3311_v35 = vpack.c.bf16 %v2269_v33, %v2268_v32 }
 0x263   : > { %3297 = vmatpush3.bf16.msra.mxu0 %v3296_v37  ;;  %v2430_v37 = vld [vmem:[%s3998_s1 + $0x308] sm:$0xff] }
 0x264   : > { %3298 = vmatprep.subr.bf16.mxu0 %v3382_v45  ;;  %v3326_v40 = vpack.c.bf16 %v2430_v37, %v2429_v36 }
 0x267   : > { %3300 = vmatpush3.bf16.msra.mxu0 %v3299_v44  ;;  %v3329_v44 = vpack.c.bf16 %v2432_v43, %v2431_v42 }
 0x268   : > { %3313 = vmatprep.subr.bf16.mxu0 %v3382_v45 }
 0x30d   : > { %v1535_v49 = vpop.f32.mrb[30].mxu0  ;;  %v1687_v50 = vpop.f32.mrb[36].mxu1 }
 0x30e   : > { %v2993_v51 = vpop.f32.mrb[31].mxu0  ;;  %v3015_v52 = vpop.f32.mrb[37].mxu1 }
 0x30f   : > { %v2437_v51 = vld [vmem:[%s3998_s1 + $0x340] sm:$0xff]  ;;  %v2438_v52 = vld [vmem:[%s3998_s1 + $0x348] sm:$0xff] }
 0x315   : > { %v1608_v53 = vpop.f32.mrb[32].mxu0  ;;  %v1847_v54 = vpop.f32.mrb[38].mxu1 }
 0x316   : > { %v1609_v55 = vadd.f32 %v1608_v53, %v1535_v49  ;;  %v3004_v56 = vpop.f32.mrb[33].mxu0  ;;  %v3037_v57 = vpop.f32.mrb[39].mxu1  ;;  %v3332_v49 = vpack.c.bf16 %v2434_v47, %v2433_v46  ;;  %v3338_v53 = vpack.c.bf16 %v2438_v52, %v2437_v51 }
 0x317   : > { %v2441_v57 = vld [vmem:[%s3998_s1 + $0x360] sm:$0xff] }
 0x318   : > { %v1691_v58 = vadd.f32 %v1687_v50, %v1609_v55  ;;  %v2440_v55 = vld [vmem:[%s3998_s1 + $0x358] sm:$0xff] }
 0x31d   : > { %v1767_v59 = vpop.f32.mrb[34].mxu0  ;;  %v2007_v60 = vpop.f32.mrb[40].mxu1 }
 0x31e   : > { %v1771_v61 = vadd.f32 %v1767_v59, %v1691_v58  ;;  %v3026_v62 = vpop.f32.mrb[35].mxu0  ;;  %v3059_v63 = vpop.f32.mrb[41].mxu1  ;;  %v2442_v58 = vld [vmem:[%s3998_s1 + $0x368] sm:$0xff] }
 0x31f   : > { %v3344_v59 = vpack.c.bf16 %v2442_v58, %v2441_v57 }
 0x320   : > { %v1851_v0 = vadd.f32 %v1847_v54, %v1771_v61  ;;  %v2439_v54 = vld [vmem:[%s3998_s1 + $0x350] sm:$0xff]  ;;  %v2444_v61 = vld [vmem:[%s3998_s1 + $0x378] sm:$0xff] }
 0x321   : > { %v3341_v56 = vpack.c.bf16 %v2440_v55, %v2439_v54 }
 0x325   : > { %v1927_v1 = vpop.f32.mrb[36].mxu0 }
 0x326   : > { %v1931_v2 = vadd.f32 %v1927_v1, %v1851_v0  ;;  %v3048_v3 = vpop.f32.mrb[37].mxu0 }
 0x328   : > { %v2011_v4 = vadd.f32 %v2007_v60, %v1931_v2  ;;  %v2443_v60 = vld [vmem:[%s3998_s1 + $0x370] sm:$0xff] }
 0x329   : > { %v3347_v62 = vpack.c.bf16 %v2444_v61, %v2443_v60 }
 0x32d   : > { %v2087_v5 = vpop.f32.mrb[38].mxu0 }
 0x32e   : > { %v2091_v7 = vadd.f32 %v2087_v5, %v2011_v4  ;;  %v3070_v8 = vpop.f32.mrb[39].mxu0 }
 0x32f   : > { %v2426_v8 = vld [vmem:[%s3998_s1 + $0x2f8] sm:$0x1] }
 0x330   : > { %v2097_v11 = vadd.f32 %v2631_v6, %v2091_v7 }
 0x332   : > { %v2098_v15 = vmax.f32 %v2097_v11, 0.0 }
 0x334   : > { %v2116_v19 = vrot.slane %v2098_v15, 1  ;;  %3107 = vmatmul.mubr.msk.f32.vlgmr.msra.gmra.mrb[40].mxu0 %vm2117_vm8, %v2098_v15  ;;  %v2352_v38 = vrot.slane %v2098_v15, 3  ;;  %v2270_v41 = vrot.slane %v2098_v15, 2 }
 0x335   : > { %3315 = vmatpush3.bf16.msra.mxu0 %v3314_v14  ;;  %3144 = vmatprep.mubr.msk.f32.mxu0 %vm3383_vm3, %v3381_v39 }
 0x336   : > { %3088 = vmatmul.mubr.msk.f32.vlgmr.msra.gmra.mrb[42].mxu1 %vm2117_vm8, %v2116_v19  ;;  %3316 = vmatprep.subr.bf16.mxu0 %v3382_v45 }
 0x337   : > { %3303 = vmatpush3.bf16.msra.mxu1 %v3302_v18  ;;  %3125 = vmatprep.mubr.msk.f32.mxu1 %vm3383_vm3, %v3381_v39 }
 0x338   : > { %3304 = vmatprep.subr.bf16.mxu1 %v3382_v45 }
 0x339   : > { %3318 = vmatpush3.bf16.msra.mxu0 %v3317_v22 }
 0x33a   : > { %3319 = vmatprep.subr.bf16.mxu0 %v3382_v45 }
 0x33b   : > { %3306 = vmatpush3.bf16.msra.mxu1 %v3305_v25 }
 0x33c   : > { %3307 = vmatprep.subr.bf16.mxu1 %v3382_v45 }
 0x33d   : > { %3321 = vmatpush3.bf16.msra.mxu0 %v3320_v28 }
 0x33e   : > { %3322 = vmatprep.subr.bf16.mxu0 %v3382_v45 }
 0x33f   : > { %3309 = vmatpush3.bf16.msra.mxu1 %v3308_v31 }
 0x340   : > { %3310 = vmatprep.subr.bf16.mxu1 %v3382_v45 }
 0x341   : > { %3324 = vmatpush3.bf16.msra.mxu0 %v3323_v34 }
 0x343   : > { %3312 = vmatpush3.bf16.msra.mxu1 %v3311_v35 }
 0x344   : > { %3145 = vmatmul.mubr.msk.f32.vlgmr.msra.gmra.mrb[42].mxu0 %vm2117_vm8, %v2352_v38  ;;  %3325 = vmatprep.subr.bf16.mxu1 %v3382_v45 }
 0x346   : > { %3126 = vmatmul.mubr.msk.f32.vlgmr.msra.gmra.mrb[44].mxu1 %vm2117_vm8, %v2270_v41 }
 0x347   : > { %3327 = vmatpush3.bf16.msra.mxu1 %v3326_v40  ;;  %3179 = vmatprep.mubr.msk.f32.mxu1 %vm3383_vm3, %v3381_v39  ;;  %v2436_v39 = vld [vmem:[%s3998_s1 + $0x338] sm:$0xff] }
 0x348   : > { %3328 = vmatprep.subr.bf16.mxu1 %v3382_v45  ;;  %v3335_v50 = vpack.c.bf16 %v2436_v39, %v2435_v48 }
 0x34b   : > { %3330 = vmatpush3.bf16.msra.mxu1 %v3329_v44 }
 0x34c   : > { %3331 = vmatprep.subr.bf16.mxu1 %v3382_v45 }
 0x34f   : > { %3333 = vmatpush3.bf16.msra.mxu1 %v3332_v49 }
 0x350   : > { %3334 = vmatprep.subr.bf16.mxu1 %v3382_v45 }
 0x353   : > { %3336 = vmatpush3.bf16.msra.mxu1 %v3335_v50 }
 0x354   : > { %3337 = vmatprep.subr.bf16.mxu1 %v3382_v45 }
 0x357   : > { %3339 = vmatpush3.bf16.msra.mxu1 %v3338_v53 }
 0x358   : > { %3340 = vmatprep.subr.bf16.mxu1 %v3382_v45 }
 0x35b   : > { %3342 = vmatpush3.bf16.msra.mxu1 %v3341_v56 }
 0x35c   : > { %3343 = vmatprep.subr.bf16.mxu1 %v3382_v45 }
 0x35f   : > { %3345 = vmatpush3.bf16.msra.mxu1 %v3344_v59 }
 0x360   : > { %3346 = vmatprep.subr.bf16.mxu1 %v3382_v45 }
 0x363   : > { %3348 = vmatpush3.bf16.msra.mxu1 %v3347_v62 }
 0x407   : > { %v2258_v63 = vpop.f32.mrb[40].mxu0 }
 0x408   : > { %v3108_v0 = vpop.f32.mrb[41].mxu0 }
 0x409   : > { %v2186_v1 = vpop.f32.mrb[42].mxu1 }
 0x40a   : > { %v2259_v2 = vadd.f32 %v2258_v63, %v2186_v1  ;;  %v3089_v3 = vpop.f32.mrb[43].mxu1 }
 0x417   : > { %v2421_v4 = vpop.f32.mrb[42].mxu0 }
 0x418   : > { %v3146_v5 = vpop.f32.mrb[43].mxu0 }
 0x419   : > { %v2339_v6 = vpop.f32.mrb[44].mxu1 }
 0x41a   : > { %v2343_v45 = vadd.f32 %v2339_v6, %v2259_v2  ;;  %v3127_v7 = vpop.f32.mrb[45].mxu1 }
 0x41c   : > { %v2425_v9 = vadd.f32 %v2421_v4, %v2343_v45 }
 0x41e   : > { %v2427_v10 = vadd.f32 %v2426_v8, %v2425_v9 }
 0x420   : > { %v2428_v11 = vmax.f32 %v2427_v10, 0.0 }
 0x422   : > { %3180 = vmatmul.mubr.f32.vlgmr.msra.gmra.mrb[46].mxu1 %v2428_v11 }
 0x4f5   : > { %v2512_v13 = vpop.f32.mrb[46].mxu1 }
 0x4f6   : > { %v2513_v14 = vadd.f32 %v2512_v13, %v2445_v12  ;;  %v3181_v15 = vpop.f32.mrb[47].mxu1 }
 0x4f8   : > { %2516 = vst.msk [vmem:[%s139_s7] sm:$0x1] %vm527_vm2, %v2513_v14 }
 0x4f9 PF: > { %s12_s9 = sadd.s32 1, %s3379_s9  }
 0x4fa   : > { %p9_p4 = scmp.ge.s32.totalorder %s12_s9, 4  }
 0x4fc   :  { %11 = sbr.rel (!%p9_p4) target bundleno = 1 (0x1), region = 91 }

</bundles_post_ra>
